<compile_context>
chip_gen: v7x
topology: tpu7x:2x2x1
jax: 0.10.0
libtpu: 0.0.40
codegen_flags: <defaults>
</compile_context>

<pallas_src>
import math
from functools import partial

import jax
import jax.numpy as jnp
from jax import lax
from jax.experimental import pallas as pl
from jax.experimental.pallas import tpu as pltpu

VMEM_SPEC = pl.BlockSpec(memory_space=pltpu.MemorySpace.VMEM)
F32 = jnp.float32
NEG_INF = -1e30


# --------------------------- in-kernel helpers ---------------------------

def _iota2(shape, dim):
    return lax.broadcasted_iota(jnp.int32, shape, dim).astype(F32)


def _eye(n):
    return (lax.broadcasted_iota(jnp.int32, (n, n), 0) ==
            lax.broadcasted_iota(jnp.int32, (n, n), 1)).astype(F32)


def _block_id(idx_f, blk):
    # floor(idx / blk) computed in f32 (exact for small integer idx values).
    return jnp.floor((idx_f + 0.5) * (1.0 / blk))


def _block_mask(n, blk):
    # [i, j] = True iff rows i and j belong to the same contiguous block.
    ri = _iota2((n, n), 0)
    cj = _iota2((n, n), 1)
    return _block_id(ri, blk) == _block_id(cj, blk)


def _col_as_rows(v_col, nrows):
    # v_col: (M, 1) -> (nrows, M) with out[i, j] = v_col[j, 0].
    # Done as ones @ diag(v): a small standard matmul, avoids any in-kernel
    # transpose / relayout of a column vector.
    m = v_col.shape[0]
    diag = _eye(m) * v_col
    ones = jnp.ones((nrows, m), F32)
    return jnp.dot(ones, diag, preferred_element_type=F32)


def _gcn_prop(adj, m, *, add_self_loops):
    # D^-1/2 (A [+ I]) D^-1/2 @ m, with the right-hand D^-1/2 folded into m so
    # no (1, N) row vector is ever materialized.
    a = adj + _eye(adj.shape[0]) if add_self_loops else adj
    deg = jnp.sum(a, axis=-1, keepdims=True)
    dinv = jnp.where(deg > 0, lax.rsqrt(deg + 1e-12), 0.0)
    return dinv * jnp.dot(a, dinv * m, preferred_element_type=F32)


def _gcn_relu(adj, x, w, b):
    # (A_hat @ X) @ W ordering: cheaper when in_features < out_features.
    h = _gcn_prop(adj, x, add_self_loops=True)
    return jnp.maximum(jnp.dot(h, w, preferred_element_type=F32) + b, 0.0)


def _topk_select(score, npg, k, num_graphs):
    # score: (N, 1); graphs are contiguous blocks of `npg` rows.
    # Returns S: (num_graphs*k, N) one-hot selection matrix picking the k
    # highest-scoring nodes of each graph, ordered by descending score
    # (ties -> lower index first), i.e. the same ordering as lax.top_k.
    n = score.shape[0]
    nk = num_graphs * k
    score_j = _col_as_rows(score, n)                    # [i, j] = score[j]
    ri = _iota2((n, n), 0)
    cj = _iota2((n, n), 1)
    same_graph = _block_id(ri, npg) == _block_id(cj, npg)
    beats = (score_j > score) | ((score_j == score) & (cj < ri))
    rank = jnp.sum(jnp.where(same_graph & beats, 1.0, 0.0),
                   axis=-1, keepdims=True)              # within-graph rank, (N, 1)
    rank_n = _col_as_rows(rank, nk)                     # (nk, N)
    rr = _iota2((nk, n), 0)
    nn = _iota2((nk, n), 1)
    row_graph = _block_id(rr, k)
    row_slot = rr - k * row_graph
    node_graph = _block_id(nn, npg)
    sel = (node_graph == row_graph) & (rank_n == row_slot)
    return sel.astype(F32)


def _sl_attention(x, adj_ind, gmask, a_src, a_dst, lamb):
    # Dense HGP-SL structure learning: row-softmax (within graph) of
    #   leaky_relu(x_i . a_src + x_j . a_dst) + lamb * adj[i, j]
    nk = x.shape[0]
    s = jnp.sum(x * a_src, axis=-1, keepdims=True)      # (nk, 1) VPU reduce
    d = jnp.sum(x * a_dst, axis=-1, keepdims=True)      # (nk, 1)
    logits = s + _col_as_rows(d, nk)                    # [i, j] = s[i] + d[j]
    logits = jnp.where(logits > 0, logits, 0.2 * logits)   # leaky_relu(0.2)
    logits = logits + lamb * adj_ind
    logits = jnp.where(gmask, logits, NEG_INF)
    m = jnp.max(logits, axis=-1, keepdims=True)
    e = jnp.where(gmask, jnp.exp(logits - m), 0.0)
    return e / jnp.sum(e, axis=-1, keepdims=True)


def _readout(x, num_graphs, k):
    # [global_max_pool | global_mean_pool] -> (B, 2H) written as one slab.
    nk, h = x.shape
    b_id = lax.broadcasted_iota(jnp.int32, (num_graphs, nk, h), 0).astype(F32)
    r_id = lax.broadcasted_iota(jnp.int32, (num_graphs, nk, h), 1).astype(F32)
    m3 = _block_id(r_id, k) == b_id                     # (B, nk, H) membership
    xmax = jnp.max(jnp.where(m3, x, NEG_INF), axis=1)
    xmean = jnp.sum(jnp.where(m3, x, 0.0), axis=1) * (1.0 / k)
    return jnp.concatenate([xmax, xmean], axis=-1)


# ------------------------------ fused kernel ------------------------------

def hgpsl_forward_kernel(
        adj_ref, x_ref,
        c1w_ref, c1b_ref, c2w_ref, c2b_ref, c3w_ref, c3b_ref,
        p1src_ref, p1dst_ref, p2src_ref, p2dst_ref,
        bns_ref, bnb_ref,
        l1w_ref, l1b_ref, l2w_ref, l2b_ref, l3w_ref, l3b_ref,
        xconv1_ref, xfeat_ref, logp_ref,
        *, num_graphs, npg, k1, k2, lamb):
    adj0 = adj_ref[...]

    # ---- conv1 (GCNConv + relu) ----
    x = _gcn_relu(adj0, x_ref[...], c1w_ref[...], c1b_ref[...])
    xconv1_ref[...] = x                                  # returned as x__

    # ---- pool1: info score -> per-graph top-k -> structure learning ----
    score = jnp.sum(jnp.abs(x - _gcn_prop(adj0, x, add_self_loops=False)),
                    axis=-1, keepdims=True)
    S = _topk_select(score, npg, k1, num_graphs)
    x = jnp.dot(S, x, preferred_element_type=F32)        # (B*k1, H)
    adj_ind = lax.dot_general(jnp.dot(S, adj0, preferred_element_type=F32), S,
                              (((1,), (1,)), ((), ())),
                              preferred_element_type=F32)     # S A S^T
    gmask = _block_mask(num_graphs * k1, k1)
    adj1 = _sl_attention(x, adj_ind, gmask, p1src_ref[...], p1dst_ref[...], lamb)
    x1 = _readout(x, num_graphs, k1)

    # ---- batchnorm (eval mode, folded affine) + conv2 ----
    x = x * bns_ref[...] + bnb_ref[...]
    x = _gcn_relu(adj1, x, c2w_ref[...], c2b_ref[...])

    # ---- pool2 ----
    score = jnp.sum(jnp.abs(x - _gcn_prop(adj1, x, add_self_loops=False)),
                    axis=-1, keepdims=True)
    S = _topk_select(score, k1, k2, num_graphs)
    x = jnp.dot(S, x, preferred_element_type=F32)        # (B*k2, H)
    adj_ind = lax.dot_general(jnp.dot(S, adj1, preferred_element_type=F32), S,
                              (((1,), (1,)), ((), ())),
                              preferred_element_type=F32)
    gmask = _block_mask(num_graphs * k2, k2)
    adj2 = _sl_attention(x, adj_ind, gmask, p2src_ref[...], p2dst_ref[...], lamb)
    x2 = _readout(x, num_graphs, k2)

    # ---- conv3 + readout ----
    x = _gcn_relu(adj2, x, c3w_ref[...], c3b_ref[...])
    x3 = _readout(x, num_graphs, k2)

    # ---- MLP head ----
    xc = jnp.maximum(x1, 0.0) + jnp.maximum(x2, 0.0) + jnp.maximum(x3, 0.0)
    h = jnp.maximum(jnp.dot(xc, l1w_ref[...], preferred_element_type=F32)
                    + l1b_ref[...], 0.0)
    # TODO(synk): F.dropout needs RNG in training mode; eval-mode identity used.
    h = jnp.maximum(jnp.dot(h, l2w_ref[...], preferred_element_type=F32)
                    + l2b_ref[...], 0.0)
    xfeat_ref[...] = h                                   # returned as x_
    z = jnp.dot(h, l3w_ref[...], preferred_element_type=F32) + l3b_ref[...]
    m = jnp.max(z, axis=-1, keepdims=True)
    logp_ref[...] = z - (jnp.log(jnp.sum(jnp.exp(z - m), axis=-1, keepdims=True)) + m)


# ------------------------------ wrapper ------------------------------

def model_forward(params, x, adj, num_graphs, nodes_per_graph, args):
    N = x.shape[0]
    H = params['conv1_w'].shape[1]
    C = params['lin3_w'].shape[1]
    k1 = int(math.ceil(args['pooling_ratio'] * nodes_per_graph))
    k2 = int(math.ceil(args['pooling_ratio'] * k1))

    # BatchNorm (eval) folded into one affine, fused with conv2 in the kernel.
    bn_scale = params['bn_gamma'] * lax.rsqrt(params['bn_var'] + 1e-5)
    bn_shift = params['bn_beta'] - params['bn_mean'] * bn_scale

    kernel = partial(hgpsl_forward_kernel, num_graphs=num_graphs,
                     npg=nodes_per_graph, k1=k1, k2=k2,
                     lamb=float(args['lamb']))
    out_shapes = (
        jax.ShapeDtypeStruct((N, H), jnp.float32),            # x__ (conv1 feats)
        jax.ShapeDtypeStruct((num_graphs, H // 2), jnp.float32),  # x_
        jax.ShapeDtypeStruct((num_graphs, C), jnp.float32),       # log_softmax
    )
    fwd = pl.pallas_call(
        kernel,
        out_shape=out_shapes,
        in_specs=[VMEM_SPEC] * 20,
        out_specs=(VMEM_SPEC,) * 3,
    )
    x_conv1, x_feat, log_probs = fwd(
        adj, x,
        params['conv1_w'], params['conv1_b'],
        params['conv2_w'], params['conv2_b'],
        params['conv3_w'], params['conv3_b'],
        params['pool1_att_src'], params['pool1_att_dst'],
        params['pool2_att_src'], params['pool2_att_dst'],
        bn_scale, bn_shift,
        params['lin1_w'], params['lin1_b'],
        params['lin2_w'], params['lin2_b'],
        params['lin3_w'], params['lin3_b'])
    return x_feat, log_probs, x_conv1


# ------------------------------ main ------------------------------

if __name__ == "__main__":
    args = dict(num_features=8, nhid=32, num_classes=4, pooling_ratio=0.5,
                dropout_ratio=0.0, sample_neighbor=False, sparse_attention=False,
                structure_learning=True, lamb=1.0)
    B, nodes_per_graph = 2, 8
    N = B * nodes_per_graph
    F_, H, C = args['num_features'], args['nhid'], args['num_classes']

    key = jax.random.PRNGKey(0)
    keys = jax.random.split(key, 12)
    params = {
        'conv1_w': 0.1 * jax.random.normal(keys[0], (F_, H), jnp.float32),
        'conv1_b': jnp.zeros((1, H), jnp.float32),
        'conv2_w': 0.1 * jax.random.normal(keys[1], (H, H), jnp.float32),
        'conv2_b': jnp.zeros((1, H), jnp.float32),
        'conv3_w': 0.1 * jax.random.normal(keys[2], (H, H), jnp.float32),
        'conv3_b': jnp.zeros((1, H), jnp.float32),
        'pool1_att_src': 0.1 * jax.random.normal(keys[3], (1, H), jnp.float32),
        'pool1_att_dst': 0.1 * jax.random.normal(keys[4], (1, H), jnp.float32),
        'pool2_att_src': 0.1 * jax.random.normal(keys[5], (1, H), jnp.float32),
        'pool2_att_dst': 0.1 * jax.random.normal(keys[6], (1, H), jnp.float32),
        'bn_gamma': jnp.ones((1, H), jnp.float32),
        'bn_beta': jnp.zeros((1, H), jnp.float32),
        'bn_mean': jnp.zeros((1, H), jnp.float32),
        'bn_var': jnp.ones((1, H), jnp.float32),
        'lin1_w': 0.1 * jax.random.normal(keys[7], (2 * H, H), jnp.float32),
        'lin1_b': jnp.zeros((1, H), jnp.float32),
        'lin2_w': 0.1 * jax.random.normal(keys[8], (H, H // 2), jnp.float32),
        'lin2_b': jnp.zeros((1, H // 2), jnp.float32),
        'lin3_w': 0.1 * jax.random.normal(keys[9], (H // 2, C), jnp.float32),
        'lin3_b': jnp.zeros((1, C), jnp.float32),
    }

    # two ring graphs of `nodes_per_graph` nodes each (edge_index -> dense adj)
    src, dst = [], []
    for g in range(B):
        for i in range(nodes_per_graph):
            a = g * nodes_per_graph + i
            b = g * nodes_per_graph + (i + 1) % nodes_per_graph
            src += [a, b]
            dst += [b, a]
    edge_index = jnp.array([src, dst], dtype=jnp.int32)
    adj = jnp.zeros((N, N), jnp.float32).at[edge_index[0], edge_index[1]].set(1.0)
    x = jax.random.normal(keys[10], (N, F_), jnp.float32)

    @jax.jit
    def run(params, x, adj):
        return model_forward(params, x, adj, B, nodes_per_graph, args)

    x_feat, log_probs, x_conv1 = run(params, x, adj)
    jax.block_until_ready((x_feat, log_probs, x_conv1))

    assert x_feat.shape == (B, H // 2)
    assert log_probs.shape == (B, C)
    assert x_conv1.shape == (N, H)
    print("KERNEL_OK")
</pallas_src>

<mosaic_0001>
module attributes {stable_mosaic.version = 11 : i64} {
  func.func @hgpsl_forward_kernel(%arg0: memref<16x16xf32, #tpu.memory_space<vmem>>, %arg1: memref<16x8xf32, #tpu.memory_space<vmem>>, %arg2: memref<8x32xf32, #tpu.memory_space<vmem>>, %arg3: memref<1x32xf32, #tpu.memory_space<vmem>>, %arg4: memref<32x32xf32, #tpu.memory_space<vmem>>, %arg5: memref<1x32xf32, #tpu.memory_space<vmem>>, %arg6: memref<32x32xf32, #tpu.memory_space<vmem>>, %arg7: memref<1x32xf32, #tpu.memory_space<vmem>>, %arg8: memref<1x32xf32, #tpu.memory_space<vmem>>, %arg9: memref<1x32xf32, #tpu.memory_space<vmem>>, %arg10: memref<1x32xf32, #tpu.memory_space<vmem>>, %arg11: memref<1x32xf32, #tpu.memory_space<vmem>>, %arg12: memref<1x32xf32, #tpu.memory_space<vmem>>, %arg13: memref<1x32xf32, #tpu.memory_space<vmem>>, %arg14: memref<64x32xf32, #tpu.memory_space<vmem>>, %arg15: memref<1x32xf32, #tpu.memory_space<vmem>>, %arg16: memref<32x16xf32, #tpu.memory_space<vmem>>, %arg17: memref<1x16xf32, #tpu.memory_space<vmem>>, %arg18: memref<16x4xf32, #tpu.memory_space<vmem>>, %arg19: memref<1x4xf32, #tpu.memory_space<vmem>>, %arg20: memref<16x32xf32, #tpu.memory_space<vmem>>, %arg21: memref<2x16xf32, #tpu.memory_space<vmem>>, %arg22: memref<2x4xf32, #tpu.memory_space<vmem>>) attributes {dimension_semantics = [], scalar_prefetch = 0 : i64, scratch_operands = 0 : i64, tpu.core_type = #tpu.core_type<tc>} {
    %c0 = arith.constant 0 : index
    %c0_0 = arith.constant 0 : index
    %0 = vector.load %arg0[%c0, %c0_0] : memref<16x16xf32, #tpu.memory_space<vmem>>, vector<16x16xf32>
    %c0_1 = arith.constant 0 : index
    %c0_2 = arith.constant 0 : index
    %1 = vector.load %arg1[%c0_1, %c0_2] : memref<16x8xf32, #tpu.memory_space<vmem>>, vector<16x8xf32>
    %c0_3 = arith.constant 0 : index
    %c0_4 = arith.constant 0 : index
    %2 = vector.load %arg2[%c0_3, %c0_4] : memref<8x32xf32, #tpu.memory_space<vmem>>, vector<8x32xf32>
    %c0_5 = arith.constant 0 : index
    %c0_6 = arith.constant 0 : index
    %3 = vector.load %arg3[%c0_5, %c0_6] : memref<1x32xf32, #tpu.memory_space<vmem>>, vector<1x32xf32>
    %4 = tpu.iota {dimensions = array<i32: 0>} : vector<16x16xi32>
    %5 = tpu.iota {dimensions = array<i32: 1>} : vector<16x16xi32>
    %6 = arith.cmpi eq, %4, %5 : vector<16x16xi32>
    %7 = arith.extui %6 : vector<16x16xi1> to vector<16x16xi32>
    %8 = arith.sitofp %7 : vector<16x16xi32> to vector<16x16xf32>
    %9 = arith.addf %0, %8 : vector<16x16xf32>
    %cst = arith.constant dense<0.000000e+00> : vector<16xf32>
    %10 = vector.multi_reduction <add>, %9, %cst [1] : vector<16x16xf32> to vector<16xf32>
    %11 = vector.shape_cast %10 : vector<16xf32> to vector<16x1xf32>
    %cst_7 = arith.constant 0.000000e+00 : f32
    %12 = vector.broadcast %cst_7 : f32 to vector<16x1xf32>
    %13 = arith.cmpf ogt, %11, %12 : vector<16x1xf32>
    %cst_8 = arith.constant 9.99999996E-13 : f32
    %14 = vector.broadcast %cst_8 : f32 to vector<16x1xf32>
    %15 = arith.addf %11, %14 : vector<16x1xf32>
    %16 = math.rsqrt %15 : vector<16x1xf32>
    %cst_9 = arith.constant 0.000000e+00 : f32
    %17 = vector.broadcast %cst_9 : f32 to vector<16x1xf32>
    %18 = arith.select %13, %16, %17 : vector<16x1xi1>, vector<16x1xf32>
    %19 = vector.broadcast %18 : vector<16x1xf32> to vector<16x8xf32>
    %20 = arith.mulf %19, %1 : vector<16x8xf32>
    %cst_10 = arith.constant dense<0.000000e+00> : vector<16x8xf32>
    %21 = tpu.matmul %9, %20, %cst_10 {dimension_numbers = #tpu.dot_dimension_numbers<[1], [0], [0], [1], [0, 0, 1, 1], [], []>} : vector<16x16xf32>, vector<16x8xf32>, vector<16x8xf32> -> vector<16x8xf32>
    %22 = vector.broadcast %18 : vector<16x1xf32> to vector<16x8xf32>
    %23 = arith.mulf %22, %21 : vector<16x8xf32>
    %cst_11 = arith.constant dense<0.000000e+00> : vector<16x32xf32>
    %24 = tpu.matmul %23, %2, %cst_11 {dimension_numbers = #tpu.dot_dimension_numbers<[1], [0], [0], [1], [0, 0, 1, 1], [], []>} : vector<16x8xf32>, vector<8x32xf32>, vector<16x32xf32> -> vector<16x32xf32>
    %25 = vector.broadcast %3 : vector<1x32xf32> to vector<16x32xf32>
    %26 = arith.addf %24, %25 : vector<16x32xf32>
    %cst_12 = arith.constant 0.000000e+00 : f32
    %27 = vector.broadcast %cst_12 : f32 to vector<16x32xf32>
    %28 = arith.maximumf %26, %27 : vector<16x32xf32>
    %c0_13 = arith.constant 0 : index
    %c0_14 = arith.constant 0 : index
    %29 = vector.load %arg20[%c0_13, %c0_14] : memref<16x32xf32, #tpu.memory_space<vmem>>, vector<16x32xf32>
    tpu.vector_store %arg20[%c0_13, %c0_14], %28 {strides = array<i32>} : memref<16x32xf32, #tpu.memory_space<vmem>>, vector<16x32xf32>,
    %cst_15 = arith.constant dense<0.000000e+00> : vector<16xf32>
    %30 = vector.multi_reduction <add>, %0, %cst_15 [1] : vector<16x16xf32> to vector<16xf32>
    %31 = vector.shape_cast %30 : vector<16xf32> to vector<16x1xf32>
    %cst_16 = arith.constant 0.000000e+00 : f32
    %32 = vector.broadcast %cst_16 : f32 to vector<16x1xf32>
    %33 = arith.cmpf ogt, %31, %32 : vector<16x1xf32>
    %cst_17 = arith.constant 9.99999996E-13 : f32
    %34 = vector.broadcast %cst_17 : f32 to vector<16x1xf32>
    %35 = arith.addf %31, %34 : vector<16x1xf32>
    %36 = math.rsqrt %35 : vector<16x1xf32>
    %cst_18 = arith.constant 0.000000e+00 : f32
    %37 = vector.broadcast %cst_18 : f32 to vector<16x1xf32>
    %38 = arith.select %33, %36, %37 : vector<16x1xi1>, vector<16x1xf32>
    %39 = vector.broadcast %38 : vector<16x1xf32> to vector<16x32xf32>
    %40 = arith.mulf %39, %28 : vector<16x32xf32>
    %cst_19 = arith.constant dense<0.000000e+00> : vector<16x32xf32>
    %41 = tpu.matmul %0, %40, %cst_19 {dimension_numbers = #tpu.dot_dimension_numbers<[1], [0], [0], [1], [0, 0, 1, 1], [], []>} : vector<16x16xf32>, vector<16x32xf32>, vector<16x32xf32> -> vector<16x32xf32>
    %42 = vector.broadcast %38 : vector<16x1xf32> to vector<16x32xf32>
    %43 = arith.mulf %42, %41 : vector<16x32xf32>
    %44 = arith.subf %28, %43 : vector<16x32xf32>
    %45 = math.absf %44 : vector<16x32xf32>
    %cst_20 = arith.constant dense<0.000000e+00> : vector<16xf32>
    %46 = vector.multi_reduction <add>, %45, %cst_20 [1] : vector<16x32xf32> to vector<16xf32>
    %47 = vector.shape_cast %46 : vector<16xf32> to vector<16x1xf32>
    %48 = tpu.iota {dimensions = array<i32: 0>} : vector<16x16xi32>
    %49 = tpu.iota {dimensions = array<i32: 1>} : vector<16x16xi32>
    %50 = arith.cmpi eq, %48, %49 : vector<16x16xi32>
    %51 = arith.extui %50 : vector<16x16xi1> to vector<16x16xi32>
    %52 = arith.sitofp %51 : vector<16x16xi32> to vector<16x16xf32>
    %53 = vector.broadcast %47 : vector<16x1xf32> to vector<16x16xf32>
    %54 = arith.mulf %52, %53 : vector<16x16xf32>
    %cst_21 = arith.constant 1.000000e+00 : f32
    %55 = vector.broadcast %cst_21 : f32 to vector<16x16xf32>
    %cst_22 = arith.constant dense<0.000000e+00> : vector<16x16xf32>
    %56 = tpu.matmul %55, %54, %cst_22 {dimension_numbers = #tpu.dot_dimension_numbers<[1], [0], [0], [1], [0, 0, 1, 1], [], []>} : vector<16x16xf32>, vector<16x16xf32>, vector<16x16xf32> -> vector<16x16xf32>
    %57 = tpu.iota {dimensions = array<i32: 0>} : vector<16x16xi32>
    %58 = arith.sitofp %57 : vector<16x16xi32> to vector<16x16xf32>
    %59 = tpu.iota {dimensions = array<i32: 1>} : vector<16x16xi32>
    %60 = arith.sitofp %59 : vector<16x16xi32> to vector<16x16xf32>
    %cst_23 = arith.constant 5.000000e-01 : f32
    %61 = vector.broadcast %cst_23 : f32 to vector<16x16xf32>
    %62 = arith.addf %58, %61 : vector<16x16xf32>
    %cst_24 = arith.constant 1.250000e-01 : f32
    %63 = vector.broadcast %cst_24 : f32 to vector<16x16xf32>
    %64 = arith.mulf %62, %63 : vector<16x16xf32>
    %65 = math.floor %64 : vector<16x16xf32>
    %cst_25 = arith.constant 5.000000e-01 : f32
    %66 = vector.broadcast %cst_25 : f32 to vector<16x16xf32>
    %67 = arith.addf %60, %66 : vector<16x16xf32>
    %cst_26 = arith.constant 1.250000e-01 : f32
    %68 = vector.broadcast %cst_26 : f32 to vector<16x16xf32>
    %69 = arith.mulf %67, %68 : vector<16x16xf32>
    %70 = math.floor %69 : vector<16x16xf32>
    %71 = arith.cmpf oeq, %65, %70 : vector<16x16xf32>
    %72 = vector.broadcast %47 : vector<16x1xf32> to vector<16x16xf32>
    %73 = arith.cmpf ogt, %56, %72 : vector<16x16xf32>
    %74 = vector.broadcast %47 : vector<16x1xf32> to vector<16x16xf32>
    %75 = arith.cmpf oeq, %56, %74 : vector<16x16xf32>
    %76 = arith.cmpf olt, %60, %58 : vector<16x16xf32>
    %77 = arith.andi %75, %76 : vector<16x16xi1>
    %78 = arith.ori %73, %77 : vector<16x16xi1>
    %79 = arith.andi %71, %78 : vector<16x16xi1>
    %cst_27 = arith.constant 1.000000e+00 : f32
    %cst_28 = arith.constant 0.000000e+00 : f32
    %80 = vector.broadcast %cst_27 : f32 to vector<16x16xf32>
    %81 = vector.broadcast %cst_28 : f32 to vector<16x16xf32>
    %82 = arith.select %79, %80, %81 : vector<16x16xi1>, vector<16x16xf32>
    %cst_29 = arith.constant dense<0.000000e+00> : vector<16xf32>
    %83 = vector.multi_reduction <add>, %82, %cst_29 [1] : vector<16x16xf32> to vector<16xf32>
    %84 = vector.shape_cast %83 : vector<16xf32> to vector<16x1xf32>
    %85 = tpu.iota {dimensions = array<i32: 0>} : vector<16x16xi32>
    %86 = tpu.iota {dimensions = array<i32: 1>} : vector<16x16xi32>
    %87 = arith.cmpi eq, %85, %86 : vector<16x16xi32>
    %88 = arith.extui %87 : vector<16x16xi1> to vector<16x16xi32>
    %89 = arith.sitofp %88 : vector<16x16xi32> to vector<16x16xf32>
    %90 = vector.broadcast %84 : vector<16x1xf32> to vector<16x16xf32>
    %91 = arith.mulf %89, %90 : vector<16x16xf32>
    %cst_30 = arith.constant 1.000000e+00 : f32
    %92 = vector.broadcast %cst_30 : f32 to vector<8x16xf32>
    %cst_31 = arith.constant dense<0.000000e+00> : vector<8x16xf32>
    %93 = tpu.matmul %92, %91, %cst_31 {dimension_numbers = #tpu.dot_dimension_numbers<[1], [0], [0], [1], [0, 0, 1, 1], [], []>} : vector<8x16xf32>, vector<16x16xf32>, vector<8x16xf32> -> vector<8x16xf32>
    %94 = tpu.iota {dimensions = array<i32: 0>} : vector<8x16xi32>
    %95 = arith.sitofp %94 : vector<8x16xi32> to vector<8x16xf32>
    %96 = tpu.iota {dimensions = array<i32: 1>} : vector<8x16xi32>
    %97 = arith.sitofp %96 : vector<8x16xi32> to vector<8x16xf32>
    %cst_32 = arith.constant 5.000000e-01 : f32
    %98 = vector.broadcast %cst_32 : f32 to vector<8x16xf32>
    %99 = arith.addf %95, %98 : vector<8x16xf32>
    %cst_33 = arith.constant 2.500000e-01 : f32
    %100 = vector.broadcast %cst_33 : f32 to vector<8x16xf32>
    %101 = arith.mulf %99, %100 : vector<8x16xf32>
    %102 = math.floor %101 : vector<8x16xf32>
    %cst_34 = arith.constant 4.000000e+00 : f32
    %103 = vector.broadcast %cst_34 : f32 to vector<8x16xf32>
    %104 = arith.mulf %103, %102 : vector<8x16xf32>
    %105 = arith.subf %95, %104 : vector<8x16xf32>
    %cst_35 = arith.constant 5.000000e-01 : f32
    %106 = vector.broadcast %cst_35 : f32 to vector<8x16xf32>
    %107 = arith.addf %97, %106 : vector<8x16xf32>
    %cst_36 = arith.constant 1.250000e-01 : f32
    %108 = vector.broadcast %cst_36 : f32 to vector<8x16xf32>
    %109 = arith.mulf %107, %108 : vector<8x16xf32>
    %110 = math.floor %109 : vector<8x16xf32>
    %111 = arith.cmpf oeq, %110, %102 : vector<8x16xf32>
    %112 = arith.cmpf oeq, %93, %105 : vector<8x16xf32>
    %113 = arith.andi %111, %112 : vector<8x16xi1>
    %114 = arith.extui %113 : vector<8x16xi1> to vector<8x16xi32>
    %115 = arith.sitofp %114 : vector<8x16xi32> to vector<8x16xf32>
    %cst_37 = arith.constant dense<0.000000e+00> : vector<8x32xf32>
    %116 = tpu.matmul %115, %28, %cst_37 {dimension_numbers = #tpu.dot_dimension_numbers<[1], [0], [0], [1], [0, 0, 1, 1], [], []>} : vector<8x16xf32>, vector<16x32xf32>, vector<8x32xf32> -> vector<8x32xf32>
    %cst_38 = arith.constant dense<0.000000e+00> : vector<8x16xf32>
    %117 = tpu.matmul %115, %0, %cst_38 {dimension_numbers = #tpu.dot_dimension_numbers<[1], [0], [0], [1], [0, 0, 1, 1], [], []>} : vector<8x16xf32>, vector<16x16xf32>, vector<8x16xf32> -> vector<8x16xf32>
    %cst_39 = arith.constant dense<0.000000e+00> : vector<8x8xf32>
    %118 = tpu.matmul %117, %115, %cst_39 {dimension_numbers = #tpu.dot_dimension_numbers<[1], [1], [0], [0], [0, 0, 1, 0], [], []>} : vector<8x16xf32>, vector<8x16xf32>, vector<8x8xf32> -> vector<8x8xf32>
    %119 = tpu.iota {dimensions = array<i32: 0>} : vector<8x8xi32>
    %120 = arith.sitofp %119 : vector<8x8xi32> to vector<8x8xf32>
    %121 = tpu.iota {dimensions = array<i32: 1>} : vector<8x8xi32>
    %122 = arith.sitofp %121 : vector<8x8xi32> to vector<8x8xf32>
    %cst_40 = arith.constant 5.000000e-01 : f32
    %123 = vector.broadcast %cst_40 : f32 to vector<8x8xf32>
    %124 = arith.addf %120, %123 : vector<8x8xf32>
    %cst_41 = arith.constant 2.500000e-01 : f32
    %125 = vector.broadcast %cst_41 : f32 to vector<8x8xf32>
    %126 = arith.mulf %124, %125 : vector<8x8xf32>
    %127 = math.floor %126 : vector<8x8xf32>
    %cst_42 = arith.constant 5.000000e-01 : f32
    %128 = vector.broadcast %cst_42 : f32 to vector<8x8xf32>
    %129 = arith.addf %122, %128 : vector<8x8xf32>
    %cst_43 = arith.constant 2.500000e-01 : f32
    %130 = vector.broadcast %cst_43 : f32 to vector<8x8xf32>
    %131 = arith.mulf %129, %130 : vector<8x8xf32>
    %132 = math.floor %131 : vector<8x8xf32>
    %133 = arith.cmpf oeq, %127, %132 : vector<8x8xf32>
    %c0_44 = arith.constant 0 : index
    %c0_45 = arith.constant 0 : index
    %134 = vector.load %arg8[%c0_44, %c0_45] : memref<1x32xf32, #tpu.memory_space<vmem>>, vector<1x32xf32>
    %c0_46 = arith.constant 0 : index
    %c0_47 = arith.constant 0 : index
    %135 = vector.load %arg9[%c0_46, %c0_47] : memref<1x32xf32, #tpu.memory_space<vmem>>, vector<1x32xf32>
    %136 = vector.broadcast %134 : vector<1x32xf32> to vector<8x32xf32>
    %137 = arith.mulf %116, %136 : vector<8x32xf32>
    %cst_48 = arith.constant dense<0.000000e+00> : vector<8xf32>
    %138 = vector.multi_reduction <add>, %137, %cst_48 [1] : vector<8x32xf32> to vector<8xf32>
    %139 = vector.shape_cast %138 : vector<8xf32> to vector<8x1xf32>
    %140 = vector.broadcast %135 : vector<1x32xf32> to vector<8x32xf32>
    %141 = arith.mulf %116, %140 : vector<8x32xf32>
    %cst_49 = arith.constant dense<0.000000e+00> : vector<8xf32>
    %142 = vector.multi_reduction <add>, %141, %cst_49 [1] : vector<8x32xf32> to vector<8xf32>
    %143 = vector.shape_cast %142 : vector<8xf32> to vector<8x1xf32>
    %144 = tpu.iota {dimensions = array<i32: 0>} : vector<8x8xi32>
    %145 = tpu.iota {dimensions = array<i32: 1>} : vector<8x8xi32>
    %146 = arith.cmpi eq, %144, %145 : vector<8x8xi32>
    %147 = arith.extui %146 : vector<8x8xi1> to vector<8x8xi32>
    %148 = arith.sitofp %147 : vector<8x8xi32> to vector<8x8xf32>
    %149 = vector.broadcast %143 : vector<8x1xf32> to vector<8x8xf32>
    %150 = arith.mulf %148, %149 : vector<8x8xf32>
    %cst_50 = arith.constant 1.000000e+00 : f32
    %151 = vector.broadcast %cst_50 : f32 to vector<8x8xf32>
    %cst_51 = arith.constant dense<0.000000e+00> : vector<8x8xf32>
    %152 = tpu.matmul %151, %150, %cst_51 {dimension_numbers = #tpu.dot_dimension_numbers<[1], [0], [0], [1], [0, 0, 1, 1], [], []>} : vector<8x8xf32>, vector<8x8xf32>, vector<8x8xf32> -> vector<8x8xf32>
    %153 = vector.broadcast %139 : vector<8x1xf32> to vector<8x8xf32>
    %154 = arith.addf %153, %152 : vector<8x8xf32>
    %cst_52 = arith.constant 0.000000e+00 : f32
    %155 = vector.broadcast %cst_52 : f32 to vector<8x8xf32>
    %156 = arith.cmpf ogt, %154, %155 : vector<8x8xf32>
    %cst_53 = arith.constant 2.000000e-01 : f32
    %157 = vector.broadcast %cst_53 : f32 to vector<8x8xf32>
    %158 = arith.mulf %157, %154 : vector<8x8xf32>
    %159 = arith.select %156, %154, %158 : vector<8x8xi1>, vector<8x8xf32>
    %cst_54 = arith.constant 1.000000e+00 : f32
    %160 = vector.broadcast %cst_54 : f32 to vector<8x8xf32>
    %161 = arith.mulf %160, %118 : vector<8x8xf32>
    %162 = arith.addf %159, %161 : vector<8x8xf32>
    %cst_55 = arith.constant -1.000000e+30 : f32
    %163 = vector.broadcast %cst_55 : f32 to vector<8x8xf32>
    %164 = arith.select %133, %162, %163 : vector<8x8xi1>, vector<8x8xf32>
    %cst_56 = arith.constant dense<0xFF800000> : vector<8xf32>
    %165 = vector.multi_reduction <maximumf>, %164, %cst_56 [1] : vector<8x8xf32> to vector<8xf32>
    %166 = vector.shape_cast %165 : vector<8xf32> to vector<8x1xf32>
    %167 = vector.broadcast %166 : vector<8x1xf32> to vector<8x8xf32>
    %168 = arith.subf %164, %167 : vector<8x8xf32>
    %169 = math.exp %168 : vector<8x8xf32>
    %cst_57 = arith.constant 0.000000e+00 : f32
    %170 = vector.broadcast %cst_57 : f32 to vector<8x8xf32>
    %171 = arith.select %133, %169, %170 : vector<8x8xi1>, vector<8x8xf32>
    %cst_58 = arith.constant dense<0.000000e+00> : vector<8xf32>
    %172 = vector.multi_reduction <add>, %171, %cst_58 [1] : vector<8x8xf32> to vector<8xf32>
    %173 = vector.shape_cast %172 : vector<8xf32> to vector<8x1xf32>
    %174 = vector.broadcast %173 : vector<8x1xf32> to vector<8x8xf32>
    %175 = arith.divf %171, %174 : vector<8x8xf32>
    %176 = tpu.iota {dimensions = array<i32: 0>} : vector<2x8x32xi32>
    %177 = arith.sitofp %176 : vector<2x8x32xi32> to vector<2x8x32xf32>
    %178 = tpu.iota {dimensions = array<i32: 1>} : vector<2x8x32xi32>
    %179 = arith.sitofp %178 : vector<2x8x32xi32> to vector<2x8x32xf32>
    %cst_59 = arith.constant 5.000000e-01 : f32
    %180 = vector.broadcast %cst_59 : f32 to vector<2x8x32xf32>
    %181 = arith.addf %179, %180 : vector<2x8x32xf32>
    %cst_60 = arith.constant 2.500000e-01 : f32
    %182 = vector.broadcast %cst_60 : f32 to vector<2x8x32xf32>
    %183 = arith.mulf %181, %182 : vector<2x8x32xf32>
    %184 = math.floor %183 : vector<2x8x32xf32>
    %185 = arith.cmpf oeq, %184, %177 : vector<2x8x32xf32>
    %cst_61 = arith.constant -1.000000e+30 : f32
    %186 = vector.shape_cast %116 : vector<8x32xf32> to vector<1x8x32xf32>
    %187 = vector.broadcast %186 : vector<1x8x32xf32> to vector<2x8x32xf32>
    %188 = vector.broadcast %cst_61 : f32 to vector<2x8x32xf32>
    %189 = arith.select %185, %187, %188 : vector<2x8x32xi1>, vector<2x8x32xf32>
    %cst_62 = arith.constant dense<0xFF800000> : vector<2x32xf32>
    %190 = vector.multi_reduction <maximumf>, %189, %cst_62 [1] : vector<2x8x32xf32> to vector<2x32xf32>
    %cst_63 = arith.constant 0.000000e+00 : f32
    %191 = vector.shape_cast %116 : vector<8x32xf32> to vector<1x8x32xf32>
    %192 = vector.broadcast %191 : vector<1x8x32xf32> to vector<2x8x32xf32>
    %193 = vector.broadcast %cst_63 : f32 to vector<2x8x32xf32>
    %194 = arith.select %185, %192, %193 : vector<2x8x32xi1>, vector<2x8x32xf32>
    %cst_64 = arith.constant dense<0.000000e+00> : vector<2x32xf32>
    %195 = vector.multi_reduction <add>, %194, %cst_64 [1] : vector<2x8x32xf32> to vector<2x32xf32>
    %cst_65 = arith.constant 2.500000e-01 : f32
    %196 = vector.broadcast %cst_65 : f32 to vector<2x32xf32>
    %197 = arith.mulf %195, %196 : vector<2x32xf32>
    %198 = tpu.concatenate %190, %197 in 1 : vector<2x32xf32>, vector<2x32xf32> -> vector<2x64xf32>
    %c0_66 = arith.constant 0 : index
    %c0_67 = arith.constant 0 : index
    %199 = vector.load %arg12[%c0_66, %c0_67] : memref<1x32xf32, #tpu.memory_space<vmem>>, vector<1x32xf32>
    %200 = vector.broadcast %199 : vector<1x32xf32> to vector<8x32xf32>
    %201 = arith.mulf %116, %200 : vector<8x32xf32>
    %c0_68 = arith.constant 0 : index
    %c0_69 = arith.constant 0 : index
    %202 = vector.load %arg13[%c0_68, %c0_69] : memref<1x32xf32, #tpu.memory_space<vmem>>, vector<1x32xf32>
    %203 = vector.broadcast %202 : vector<1x32xf32> to vector<8x32xf32>
    %204 = arith.addf %201, %203 : vector<8x32xf32>
    %c0_70 = arith.constant 0 : index
    %c0_71 = arith.constant 0 : index
    %205 = vector.load %arg4[%c0_70, %c0_71] : memref<32x32xf32, #tpu.memory_space<vmem>>, vector<32x32xf32>
    %c0_72 = arith.constant 0 : index
    %c0_73 = arith.constant 0 : index
    %206 = vector.load %arg5[%c0_72, %c0_73] : memref<1x32xf32, #tpu.memory_space<vmem>>, vector<1x32xf32>
    %207 = tpu.iota {dimensions = array<i32: 0>} : vector<8x8xi32>
    %208 = tpu.iota {dimensions = array<i32: 1>} : vector<8x8xi32>
    %209 = arith.cmpi eq, %207, %208 : vector<8x8xi32>
    %210 = arith.extui %209 : vector<8x8xi1> to vector<8x8xi32>
    %211 = arith.sitofp %210 : vector<8x8xi32> to vector<8x8xf32>
    %212 = arith.addf %175, %211 : vector<8x8xf32>
    %cst_74 = arith.constant dense<0.000000e+00> : vector<8xf32>
    %213 = vector.multi_reduction <add>, %212, %cst_74 [1] : vector<8x8xf32> to vector<8xf32>
    %214 = vector.shape_cast %213 : vector<8xf32> to vector<8x1xf32>
    %cst_75 = arith.constant 0.000000e+00 : f32
    %215 = vector.broadcast %cst_75 : f32 to vector<8x1xf32>
    %216 = arith.cmpf ogt, %214, %215 : vector<8x1xf32>
    %cst_76 = arith.constant 9.99999996E-13 : f32
    %217 = vector.broadcast %cst_76 : f32 to vector<8x1xf32>
    %218 = arith.addf %214, %217 : vector<8x1xf32>
    %219 = math.rsqrt %218 : vector<8x1xf32>
    %cst_77 = arith.constant 0.000000e+00 : f32
    %220 = vector.broadcast %cst_77 : f32 to vector<8x1xf32>
    %221 = arith.select %216, %219, %220 : vector<8x1xi1>, vector<8x1xf32>
    %222 = vector.broadcast %221 : vector<8x1xf32> to vector<8x32xf32>
    %223 = arith.mulf %222, %204 : vector<8x32xf32>
    %cst_78 = arith.constant dense<0.000000e+00> : vector<8x32xf32>
    %224 = tpu.matmul %212, %223, %cst_78 {dimension_numbers = #tpu.dot_dimension_numbers<[1], [0], [0], [1], [0, 0, 1, 1], [], []>} : vector<8x8xf32>, vector<8x32xf32>, vector<8x32xf32> -> vector<8x32xf32>
    %225 = vector.broadcast %221 : vector<8x1xf32> to vector<8x32xf32>
    %226 = arith.mulf %225, %224 : vector<8x32xf32>
    %cst_79 = arith.constant dense<0.000000e+00> : vector<8x32xf32>
    %227 = tpu.matmul %226, %205, %cst_79 {dimension_numbers = #tpu.dot_dimension_numbers<[1], [0], [0], [1], [0, 0, 1, 1], [], []>} : vector<8x32xf32>, vector<32x32xf32>, vector<8x32xf32> -> vector<8x32xf32>
    %228 = vector.broadcast %206 : vector<1x32xf32> to vector<8x32xf32>
    %229 = arith.addf %227, %228 : vector<8x32xf32>
    %cst_80 = arith.constant 0.000000e+00 : f32
    %230 = vector.broadcast %cst_80 : f32 to vector<8x32xf32>
    %231 = arith.maximumf %229, %230 : vector<8x32xf32>
    %cst_81 = arith.constant dense<0.000000e+00> : vector<8xf32>
    %232 = vector.multi_reduction <add>, %175, %cst_81 [1] : vector<8x8xf32> to vector<8xf32>
    %233 = vector.shape_cast %232 : vector<8xf32> to vector<8x1xf32>
    %cst_82 = arith.constant 0.000000e+00 : f32
    %234 = vector.broadcast %cst_82 : f32 to vector<8x1xf32>
    %235 = arith.cmpf ogt, %233, %234 : vector<8x1xf32>
    %cst_83 = arith.constant 9.99999996E-13 : f32
    %236 = vector.broadcast %cst_83 : f32 to vector<8x1xf32>
    %237 = arith.addf %233, %236 : vector<8x1xf32>
    %238 = math.rsqrt %237 : vector<8x1xf32>
    %cst_84 = arith.constant 0.000000e+00 : f32
    %239 = vector.broadcast %cst_84 : f32 to vector<8x1xf32>
    %240 = arith.select %235, %238, %239 : vector<8x1xi1>, vector<8x1xf32>
    %241 = vector.broadcast %240 : vector<8x1xf32> to vector<8x32xf32>
    %242 = arith.mulf %241, %231 : vector<8x32xf32>
    %cst_85 = arith.constant dense<0.000000e+00> : vector<8x32xf32>
    %243 = tpu.matmul %175, %242, %cst_85 {dimension_numbers = #tpu.dot_dimension_numbers<[1], [0], [0], [1], [0, 0, 1, 1], [], []>} : vector<8x8xf32>, vector<8x32xf32>, vector<8x32xf32> -> vector<8x32xf32>
    %244 = vector.broadcast %240 : vector<8x1xf32> to vector<8x32xf32>
    %245 = arith.mulf %244, %243 : vector<8x32xf32>
    %246 = arith.subf %231, %245 : vector<8x32xf32>
    %247 = math.absf %246 : vector<8x32xf32>
    %cst_86 = arith.constant dense<0.000000e+00> : vector<8xf32>
    %248 = vector.multi_reduction <add>, %247, %cst_86 [1] : vector<8x32xf32> to vector<8xf32>
    %249 = vector.shape_cast %248 : vector<8xf32> to vector<8x1xf32>
    %250 = tpu.iota {dimensions = array<i32: 0>} : vector<8x8xi32>
    %251 = tpu.iota {dimensions = array<i32: 1>} : vector<8x8xi32>
    %252 = arith.cmpi eq, %250, %251 : vector<8x8xi32>
    %253 = arith.extui %252 : vector<8x8xi1> to vector<8x8xi32>
    %254 = arith.sitofp %253 : vector<8x8xi32> to vector<8x8xf32>
    %255 = vector.broadcast %249 : vector<8x1xf32> to vector<8x8xf32>
    %256 = arith.mulf %254, %255 : vector<8x8xf32>
    %cst_87 = arith.constant 1.000000e+00 : f32
    %257 = vector.broadcast %cst_87 : f32 to vector<8x8xf32>
    %cst_88 = arith.constant dense<0.000000e+00> : vector<8x8xf32>
    %258 = tpu.matmul %257, %256, %cst_88 {dimension_numbers = #tpu.dot_dimension_numbers<[1], [0], [0], [1], [0, 0, 1, 1], [], []>} : vector<8x8xf32>, vector<8x8xf32>, vector<8x8xf32> -> vector<8x8xf32>
    %259 = tpu.iota {dimensions = array<i32: 0>} : vector<8x8xi32>
    %260 = arith.sitofp %259 : vector<8x8xi32> to vector<8x8xf32>
    %261 = tpu.iota {dimensions = array<i32: 1>} : vector<8x8xi32>
    %262 = arith.sitofp %261 : vector<8x8xi32> to vector<8x8xf32>
    %cst_89 = arith.constant 5.000000e-01 : f32
    %263 = vector.broadcast %cst_89 : f32 to vector<8x8xf32>
    %264 = arith.addf %260, %263 : vector<8x8xf32>
    %cst_90 = arith.constant 2.500000e-01 : f32
    %265 = vector.broadcast %cst_90 : f32 to vector<8x8xf32>
    %266 = arith.mulf %264, %265 : vector<8x8xf32>
    %267 = math.floor %266 : vector<8x8xf32>
    %cst_91 = arith.constant 5.000000e-01 : f32
    %268 = vector.broadcast %cst_91 : f32 to vector<8x8xf32>
    %269 = arith.addf %262, %268 : vector<8x8xf32>
    %cst_92 = arith.constant 2.500000e-01 : f32
    %270 = vector.broadcast %cst_92 : f32 to vector<8x8xf32>
    %271 = arith.mulf %269, %270 : vector<8x8xf32>
    %272 = math.floor %271 : vector<8x8xf32>
    %273 = arith.cmpf oeq, %267, %272 : vector<8x8xf32>
    %274 = vector.broadcast %249 : vector<8x1xf32> to vector<8x8xf32>
    %275 = arith.cmpf ogt, %258, %274 : vector<8x8xf32>
    %276 = vector.broadcast %249 : vector<8x1xf32> to vector<8x8xf32>
    %277 = arith.cmpf oeq, %258, %276 : vector<8x8xf32>
    %278 = arith.cmpf olt, %262, %260 : vector<8x8xf32>
    %279 = arith.andi %277, %278 : vector<8x8xi1>
    %280 = arith.ori %275, %279 : vector<8x8xi1>
    %281 = arith.andi %273, %280 : vector<8x8xi1>
    %cst_93 = arith.constant 1.000000e+00 : f32
    %cst_94 = arith.constant 0.000000e+00 : f32
    %282 = vector.broadcast %cst_93 : f32 to vector<8x8xf32>
    %283 = vector.broadcast %cst_94 : f32 to vector<8x8xf32>
    %284 = arith.select %281, %282, %283 : vector<8x8xi1>, vector<8x8xf32>
    %cst_95 = arith.constant dense<0.000000e+00> : vector<8xf32>
    %285 = vector.multi_reduction <add>, %284, %cst_95 [1] : vector<8x8xf32> to vector<8xf32>
    %286 = vector.shape_cast %285 : vector<8xf32> to vector<8x1xf32>
    %287 = tpu.iota {dimensions = array<i32: 0>} : vector<8x8xi32>
    %288 = tpu.iota {dimensions = array<i32: 1>} : vector<8x8xi32>
    %289 = arith.cmpi eq, %287, %288 : vector<8x8xi32>
    %290 = arith.extui %289 : vector<8x8xi1> to vector<8x8xi32>
    %291 = arith.sitofp %290 : vector<8x8xi32> to vector<8x8xf32>
    %292 = vector.broadcast %286 : vector<8x1xf32> to vector<8x8xf32>
    %293 = arith.mulf %291, %292 : vector<8x8xf32>
    %cst_96 = arith.constant 1.000000e+00 : f32
    %294 = vector.broadcast %cst_96 : f32 to vector<4x8xf32>
    %cst_97 = arith.constant dense<0.000000e+00> : vector<4x8xf32>
    %295 = tpu.matmul %294, %293, %cst_97 {dimension_numbers = #tpu.dot_dimension_numbers<[1], [0], [0], [1], [0, 0, 1, 1], [], []>} : vector<4x8xf32>, vector<8x8xf32>, vector<4x8xf32> -> vector<4x8xf32>
    %296 = tpu.iota {dimensions = array<i32: 0>} : vector<4x8xi32>
    %297 = arith.sitofp %296 : vector<4x8xi32> to vector<4x8xf32>
    %298 = tpu.iota {dimensions = array<i32: 1>} : vector<4x8xi32>
    %299 = arith.sitofp %298 : vector<4x8xi32> to vector<4x8xf32>
    %cst_98 = arith.constant 5.000000e-01 : f32
    %300 = vector.broadcast %cst_98 : f32 to vector<4x8xf32>
    %301 = arith.addf %297, %300 : vector<4x8xf32>
    %cst_99 = arith.constant 5.000000e-01 : f32
    %302 = vector.broadcast %cst_99 : f32 to vector<4x8xf32>
    %303 = arith.mulf %301, %302 : vector<4x8xf32>
    %304 = math.floor %303 : vector<4x8xf32>
    %cst_100 = arith.constant 2.000000e+00 : f32
    %305 = vector.broadcast %cst_100 : f32 to vector<4x8xf32>
    %306 = arith.mulf %305, %304 : vector<4x8xf32>
    %307 = arith.subf %297, %306 : vector<4x8xf32>
    %cst_101 = arith.constant 5.000000e-01 : f32
    %308 = vector.broadcast %cst_101 : f32 to vector<4x8xf32>
    %309 = arith.addf %299, %308 : vector<4x8xf32>
    %cst_102 = arith.constant 2.500000e-01 : f32
    %310 = vector.broadcast %cst_102 : f32 to vector<4x8xf32>
    %311 = arith.mulf %309, %310 : vector<4x8xf32>
    %312 = math.floor %311 : vector<4x8xf32>
    %313 = arith.cmpf oeq, %312, %304 : vector<4x8xf32>
    %314 = arith.cmpf oeq, %295, %307 : vector<4x8xf32>
    %315 = arith.andi %313, %314 : vector<4x8xi1>
    %316 = arith.extui %315 : vector<4x8xi1> to vector<4x8xi32>
    %317 = arith.sitofp %316 : vector<4x8xi32> to vector<4x8xf32>
    %cst_103 = arith.constant dense<0.000000e+00> : vector<4x32xf32>
    %318 = tpu.matmul %317, %231, %cst_103 {dimension_numbers = #tpu.dot_dimension_numbers<[1], [0], [0], [1], [0, 0, 1, 1], [], []>} : vector<4x8xf32>, vector<8x32xf32>, vector<4x32xf32> -> vector<4x32xf32>
    %cst_104 = arith.constant dense<0.000000e+00> : vector<4x8xf32>
    %319 = tpu.matmul %317, %175, %cst_104 {dimension_numbers = #tpu.dot_dimension_numbers<[1], [0], [0], [1], [0, 0, 1, 1], [], []>} : vector<4x8xf32>, vector<8x8xf32>, vector<4x8xf32> -> vector<4x8xf32>
    %cst_105 = arith.constant dense<0.000000e+00> : vector<4x4xf32>
    %320 = tpu.matmul %319, %317, %cst_105 {dimension_numbers = #tpu.dot_dimension_numbers<[1], [1], [0], [0], [0, 0, 1, 0], [], []>} : vector<4x8xf32>, vector<4x8xf32>, vector<4x4xf32> -> vector<4x4xf32>
    %321 = tpu.iota {dimensions = array<i32: 0>} : vector<4x4xi32>
    %322 = arith.sitofp %321 : vector<4x4xi32> to vector<4x4xf32>
    %323 = tpu.iota {dimensions = array<i32: 1>} : vector<4x4xi32>
    %324 = arith.sitofp %323 : vector<4x4xi32> to vector<4x4xf32>
    %cst_106 = arith.constant 5.000000e-01 : f32
    %325 = vector.broadcast %cst_106 : f32 to vector<4x4xf32>
    %326 = arith.addf %322, %325 : vector<4x4xf32>
    %cst_107 = arith.constant 5.000000e-01 : f32
    %327 = vector.broadcast %cst_107 : f32 to vector<4x4xf32>
    %328 = arith.mulf %326, %327 : vector<4x4xf32>
    %329 = math.floor %328 : vector<4x4xf32>
    %cst_108 = arith.constant 5.000000e-01 : f32
    %330 = vector.broadcast %cst_108 : f32 to vector<4x4xf32>
    %331 = arith.addf %324, %330 : vector<4x4xf32>
    %cst_109 = arith.constant 5.000000e-01 : f32
    %332 = vector.broadcast %cst_109 : f32 to vector<4x4xf32>
    %333 = arith.mulf %331, %332 : vector<4x4xf32>
    %334 = math.floor %333 : vector<4x4xf32>
    %335 = arith.cmpf oeq, %329, %334 : vector<4x4xf32>
    %c0_110 = arith.constant 0 : index
    %c0_111 = arith.constant 0 : index
    %336 = vector.load %arg10[%c0_110, %c0_111] : memref<1x32xf32, #tpu.memory_space<vmem>>, vector<1x32xf32>
    %c0_112 = arith.constant 0 : index
    %c0_113 = arith.constant 0 : index
    %337 = vector.load %arg11[%c0_112, %c0_113] : memref<1x32xf32, #tpu.memory_space<vmem>>, vector<1x32xf32>
    %338 = vector.broadcast %336 : vector<1x32xf32> to vector<4x32xf32>
    %339 = arith.mulf %318, %338 : vector<4x32xf32>
    %cst_114 = arith.constant dense<0.000000e+00> : vector<4xf32>
    %340 = vector.multi_reduction <add>, %339, %cst_114 [1] : vector<4x32xf32> to vector<4xf32>
    %341 = vector.shape_cast %340 : vector<4xf32> to vector<4x1xf32>
    %342 = vector.broadcast %337 : vector<1x32xf32> to vector<4x32xf32>
    %343 = arith.mulf %318, %342 : vector<4x32xf32>
    %cst_115 = arith.constant dense<0.000000e+00> : vector<4xf32>
    %344 = vector.multi_reduction <add>, %343, %cst_115 [1] : vector<4x32xf32> to vector<4xf32>
    %345 = vector.shape_cast %344 : vector<4xf32> to vector<4x1xf32>
    %346 = tpu.iota {dimensions = array<i32: 0>} : vector<4x4xi32>
    %347 = tpu.iota {dimensions = array<i32: 1>} : vector<4x4xi32>
    %348 = arith.cmpi eq, %346, %347 : vector<4x4xi32>
    %349 = arith.extui %348 : vector<4x4xi1> to vector<4x4xi32>
    %350 = arith.sitofp %349 : vector<4x4xi32> to vector<4x4xf32>
    %351 = vector.broadcast %345 : vector<4x1xf32> to vector<4x4xf32>
    %352 = arith.mulf %350, %351 : vector<4x4xf32>
    %cst_116 = arith.constant 1.000000e+00 : f32
    %353 = vector.broadcast %cst_116 : f32 to vector<4x4xf32>
    %cst_117 = arith.constant dense<0.000000e+00> : vector<4x4xf32>
    %354 = tpu.matmul %353, %352, %cst_117 {dimension_numbers = #tpu.dot_dimension_numbers<[1], [0], [0], [1], [0, 0, 1, 1], [], []>} : vector<4x4xf32>, vector<4x4xf32>, vector<4x4xf32> -> vector<4x4xf32>
    %355 = vector.broadcast %341 : vector<4x1xf32> to vector<4x4xf32>
    %356 = arith.addf %355, %354 : vector<4x4xf32>
    %cst_118 = arith.constant 0.000000e+00 : f32
    %357 = vector.broadcast %cst_118 : f32 to vector<4x4xf32>
    %358 = arith.cmpf ogt, %356, %357 : vector<4x4xf32>
    %cst_119 = arith.constant 2.000000e-01 : f32
    %359 = vector.broadcast %cst_119 : f32 to vector<4x4xf32>
    %360 = arith.mulf %359, %356 : vector<4x4xf32>
    %361 = arith.select %358, %356, %360 : vector<4x4xi1>, vector<4x4xf32>
    %cst_120 = arith.constant 1.000000e+00 : f32
    %362 = vector.broadcast %cst_120 : f32 to vector<4x4xf32>
    %363 = arith.mulf %362, %320 : vector<4x4xf32>
    %364 = arith.addf %361, %363 : vector<4x4xf32>
    %cst_121 = arith.constant -1.000000e+30 : f32
    %365 = vector.broadcast %cst_121 : f32 to vector<4x4xf32>
    %366 = arith.select %335, %364, %365 : vector<4x4xi1>, vector<4x4xf32>
    %cst_122 = arith.constant dense<0xFF800000> : vector<4xf32>
    %367 = vector.multi_reduction <maximumf>, %366, %cst_122 [1] : vector<4x4xf32> to vector<4xf32>
    %368 = vector.shape_cast %367 : vector<4xf32> to vector<4x1xf32>
    %369 = vector.broadcast %368 : vector<4x1xf32> to vector<4x4xf32>
    %370 = arith.subf %366, %369 : vector<4x4xf32>
    %371 = math.exp %370 : vector<4x4xf32>
    %cst_123 = arith.constant 0.000000e+00 : f32
    %372 = vector.broadcast %cst_123 : f32 to vector<4x4xf32>
    %373 = arith.select %335, %371, %372 : vector<4x4xi1>, vector<4x4xf32>
    %cst_124 = arith.constant dense<0.000000e+00> : vector<4xf32>
    %374 = vector.multi_reduction <add>, %373, %cst_124 [1] : vector<4x4xf32> to vector<4xf32>
    %375 = vector.shape_cast %374 : vector<4xf32> to vector<4x1xf32>
    %376 = vector.broadcast %375 : vector<4x1xf32> to vector<4x4xf32>
    %377 = arith.divf %373, %376 : vector<4x4xf32>
    %378 = tpu.iota {dimensions = array<i32: 0>} : vector<2x4x32xi32>
    %379 = arith.sitofp %378 : vector<2x4x32xi32> to vector<2x4x32xf32>
    %380 = tpu.iota {dimensions = array<i32: 1>} : vector<2x4x32xi32>
    %381 = arith.sitofp %380 : vector<2x4x32xi32> to vector<2x4x32xf32>
    %cst_125 = arith.constant 5.000000e-01 : f32
    %382 = vector.broadcast %cst_125 : f32 to vector<2x4x32xf32>
    %383 = arith.addf %381, %382 : vector<2x4x32xf32>
    %cst_126 = arith.constant 5.000000e-01 : f32
    %384 = vector.broadcast %cst_126 : f32 to vector<2x4x32xf32>
    %385 = arith.mulf %383, %384 : vector<2x4x32xf32>
    %386 = math.floor %385 : vector<2x4x32xf32>
    %387 = arith.cmpf oeq, %386, %379 : vector<2x4x32xf32>
    %cst_127 = arith.constant -1.000000e+30 : f32
    %388 = vector.shape_cast %318 : vector<4x32xf32> to vector<1x4x32xf32>
    %389 = vector.broadcast %388 : vector<1x4x32xf32> to vector<2x4x32xf32>
    %390 = vector.broadcast %cst_127 : f32 to vector<2x4x32xf32>
    %391 = arith.select %387, %389, %390 : vector<2x4x32xi1>, vector<2x4x32xf32>
    %cst_128 = arith.constant dense<0xFF800000> : vector<2x32xf32>
    %392 = vector.multi_reduction <maximumf>, %391, %cst_128 [1] : vector<2x4x32xf32> to vector<2x32xf32>
    %cst_129 = arith.constant 0.000000e+00 : f32
    %393 = vector.shape_cast %318 : vector<4x32xf32> to vector<1x4x32xf32>
    %394 = vector.broadcast %393 : vector<1x4x32xf32> to vector<2x4x32xf32>
    %395 = vector.broadcast %cst_129 : f32 to vector<2x4x32xf32>
    %396 = arith.select %387, %394, %395 : vector<2x4x32xi1>, vector<2x4x32xf32>
    %cst_130 = arith.constant dense<0.000000e+00> : vector<2x32xf32>
    %397 = vector.multi_reduction <add>, %396, %cst_130 [1] : vector<2x4x32xf32> to vector<2x32xf32>
    %cst_131 = arith.constant 5.000000e-01 : f32
    %398 = vector.broadcast %cst_131 : f32 to vector<2x32xf32>
    %399 = arith.mulf %397, %398 : vector<2x32xf32>
    %400 = tpu.concatenate %392, %399 in 1 : vector<2x32xf32>, vector<2x32xf32> -> vector<2x64xf32>
    %c0_132 = arith.constant 0 : index
    %c0_133 = arith.constant 0 : index
    %401 = vector.load %arg6[%c0_132, %c0_133] : memref<32x32xf32, #tpu.memory_space<vmem>>, vector<32x32xf32>
    %c0_134 = arith.constant 0 : index
    %c0_135 = arith.constant 0 : index
    %402 = vector.load %arg7[%c0_134, %c0_135] : memref<1x32xf32, #tpu.memory_space<vmem>>, vector<1x32xf32>
    %403 = tpu.iota {dimensions = array<i32: 0>} : vector<4x4xi32>
    %404 = tpu.iota {dimensions = array<i32: 1>} : vector<4x4xi32>
    %405 = arith.cmpi eq, %403, %404 : vector<4x4xi32>
    %406 = arith.extui %405 : vector<4x4xi1> to vector<4x4xi32>
    %407 = arith.sitofp %406 : vector<4x4xi32> to vector<4x4xf32>
    %408 = arith.addf %377, %407 : vector<4x4xf32>
    %cst_136 = arith.constant dense<0.000000e+00> : vector<4xf32>
    %409 = vector.multi_reduction <add>, %408, %cst_136 [1] : vector<4x4xf32> to vector<4xf32>
    %410 = vector.shape_cast %409 : vector<4xf32> to vector<4x1xf32>
    %cst_137 = arith.constant 0.000000e+00 : f32
    %411 = vector.broadcast %cst_137 : f32 to vector<4x1xf32>
    %412 = arith.cmpf ogt, %410, %411 : vector<4x1xf32>
    %cst_138 = arith.constant 9.99999996E-13 : f32
    %413 = vector.broadcast %cst_138 : f32 to vector<4x1xf32>
    %414 = arith.addf %410, %413 : vector<4x1xf32>
    %415 = math.rsqrt %414 : vector<4x1xf32>
    %cst_139 = arith.constant 0.000000e+00 : f32
    %416 = vector.broadcast %cst_139 : f32 to vector<4x1xf32>
    %417 = arith.select %412, %415, %416 : vector<4x1xi1>, vector<4x1xf32>
    %418 = vector.broadcast %417 : vector<4x1xf32> to vector<4x32xf32>
    %419 = arith.mulf %418, %318 : vector<4x32xf32>
    %cst_140 = arith.constant dense<0.000000e+00> : vector<4x32xf32>
    %420 = tpu.matmul %408, %419, %cst_140 {dimension_numbers = #tpu.dot_dimension_numbers<[1], [0], [0], [1], [0, 0, 1, 1], [], []>} : vector<4x4xf32>, vector<4x32xf32>, vector<4x32xf32> -> vector<4x32xf32>
    %421 = vector.broadcast %417 : vector<4x1xf32> to vector<4x32xf32>
    %422 = arith.mulf %421, %420 : vector<4x32xf32>
    %cst_141 = arith.constant dense<0.000000e+00> : vector<4x32xf32>
    %423 = tpu.matmul %422, %401, %cst_141 {dimension_numbers = #tpu.dot_dimension_numbers<[1], [0], [0], [1], [0, 0, 1, 1], [], []>} : vector<4x32xf32>, vector<32x32xf32>, vector<4x32xf32> -> vector<4x32xf32>
    %424 = vector.broadcast %402 : vector<1x32xf32> to vector<4x32xf32>
    %425 = arith.addf %423, %424 : vector<4x32xf32>
    %cst_142 = arith.constant 0.000000e+00 : f32
    %426 = vector.broadcast %cst_142 : f32 to vector<4x32xf32>
    %427 = arith.maximumf %425, %426 : vector<4x32xf32>
    %428 = tpu.iota {dimensions = array<i32: 0>} : vector<2x4x32xi32>
    %429 = arith.sitofp %428 : vector<2x4x32xi32> to vector<2x4x32xf32>
    %430 = tpu.iota {dimensions = array<i32: 1>} : vector<2x4x32xi32>
    %431 = arith.sitofp %430 : vector<2x4x32xi32> to vector<2x4x32xf32>
    %cst_143 = arith.constant 5.000000e-01 : f32
    %432 = vector.broadcast %cst_143 : f32 to vector<2x4x32xf32>
    %433 = arith.addf %431, %432 : vector<2x4x32xf32>
    %cst_144 = arith.constant 5.000000e-01 : f32
    %434 = vector.broadcast %cst_144 : f32 to vector<2x4x32xf32>
    %435 = arith.mulf %433, %434 : vector<2x4x32xf32>
    %436 = math.floor %435 : vector<2x4x32xf32>
    %437 = arith.cmpf oeq, %436, %429 : vector<2x4x32xf32>
    %cst_145 = arith.constant -1.000000e+30 : f32
    %438 = vector.shape_cast %427 : vector<4x32xf32> to vector<1x4x32xf32>
    %439 = vector.broadcast %438 : vector<1x4x32xf32> to vector<2x4x32xf32>
    %440 = vector.broadcast %cst_145 : f32 to vector<2x4x32xf32>
    %441 = arith.select %437, %439, %440 : vector<2x4x32xi1>, vector<2x4x32xf32>
    %cst_146 = arith.constant dense<0xFF800000> : vector<2x32xf32>
    %442 = vector.multi_reduction <maximumf>, %441, %cst_146 [1] : vector<2x4x32xf32> to vector<2x32xf32>
    %cst_147 = arith.constant 0.000000e+00 : f32
    %443 = vector.shape_cast %427 : vector<4x32xf32> to vector<1x4x32xf32>
    %444 = vector.broadcast %443 : vector<1x4x32xf32> to vector<2x4x32xf32>
    %445 = vector.broadcast %cst_147 : f32 to vector<2x4x32xf32>
    %446 = arith.select %437, %444, %445 : vector<2x4x32xi1>, vector<2x4x32xf32>
    %cst_148 = arith.constant dense<0.000000e+00> : vector<2x32xf32>
    %447 = vector.multi_reduction <add>, %446, %cst_148 [1] : vector<2x4x32xf32> to vector<2x32xf32>
    %cst_149 = arith.constant 5.000000e-01 : f32
    %448 = vector.broadcast %cst_149 : f32 to vector<2x32xf32>
    %449 = arith.mulf %447, %448 : vector<2x32xf32>
    %450 = tpu.concatenate %442, %449 in 1 : vector<2x32xf32>, vector<2x32xf32> -> vector<2x64xf32>
    %cst_150 = arith.constant 0.000000e+00 : f32
    %451 = vector.broadcast %cst_150 : f32 to vector<2x64xf32>
    %452 = arith.maximumf %198, %451 : vector<2x64xf32>
    %cst_151 = arith.constant 0.000000e+00 : f32
    %453 = vector.broadcast %cst_151 : f32 to vector<2x64xf32>
    %454 = arith.maximumf %400, %453 : vector<2x64xf32>
    %455 = arith.addf %452, %454 : vector<2x64xf32>
    %cst_152 = arith.constant 0.000000e+00 : f32
    %456 = vector.broadcast %cst_152 : f32 to vector<2x64xf32>
    %457 = arith.maximumf %450, %456 : vector<2x64xf32>
    %458 = arith.addf %455, %457 : vector<2x64xf32>
    %c0_153 = arith.constant 0 : index
    %c0_154 = arith.constant 0 : index
    %459 = vector.load %arg14[%c0_153, %c0_154] : memref<64x32xf32, #tpu.memory_space<vmem>>, vector<64x32xf32>
    %cst_155 = arith.constant dense<0.000000e+00> : vector<2x32xf32>
    %460 = tpu.matmul %458, %459, %cst_155 {dimension_numbers = #tpu.dot_dimension_numbers<[1], [0], [0], [1], [0, 0, 1, 1], [], []>} : vector<2x64xf32>, vector<64x32xf32>, vector<2x32xf32> -> vector<2x32xf32>
    %c0_156 = arith.constant 0 : index
    %c0_157 = arith.constant 0 : index
    %461 = vector.load %arg15[%c0_156, %c0_157] : memref<1x32xf32, #tpu.memory_space<vmem>>, vector<1x32xf32>
    %462 = vector.broadcast %461 : vector<1x32xf32> to vector<2x32xf32>
    %463 = arith.addf %460, %462 : vector<2x32xf32>
    %cst_158 = arith.constant 0.000000e+00 : f32
    %464 = vector.broadcast %cst_158 : f32 to vector<2x32xf32>
    %465 = arith.maximumf %463, %464 : vector<2x32xf32>
    %c0_159 = arith.constant 0 : index
    %c0_160 = arith.constant 0 : index
    %466 = vector.load %arg16[%c0_159, %c0_160] : memref<32x16xf32, #tpu.memory_space<vmem>>, vector<32x16xf32>
    %cst_161 = arith.constant dense<0.000000e+00> : vector<2x16xf32>
    %467 = tpu.matmul %465, %466, %cst_161 {dimension_numbers = #tpu.dot_dimension_numbers<[1], [0], [0], [1], [0, 0, 1, 1], [], []>} : vector<2x32xf32>, vector<32x16xf32>, vector<2x16xf32> -> vector<2x16xf32>
    %c0_162 = arith.constant 0 : index
    %c0_163 = arith.constant 0 : index
    %468 = vector.load %arg17[%c0_162, %c0_163] : memref<1x16xf32, #tpu.memory_space<vmem>>, vector<1x16xf32>
    %469 = vector.broadcast %468 : vector<1x16xf32> to vector<2x16xf32>
    %470 = arith.addf %467, %469 : vector<2x16xf32>
    %cst_164 = arith.constant 0.000000e+00 : f32
    %471 = vector.broadcast %cst_164 : f32 to vector<2x16xf32>
    %472 = arith.maximumf %470, %471 : vector<2x16xf32>
    %c0_165 = arith.constant 0 : index
    %c0_166 = arith.constant 0 : index
    %473 = vector.load %arg21[%c0_165, %c0_166] : memref<2x16xf32, #tpu.memory_space<vmem>>, vector<2x16xf32>
    tpu.vector_store %arg21[%c0_165, %c0_166], %472 {strides = array<i32>} : memref<2x16xf32, #tpu.memory_space<vmem>>, vector<2x16xf32>,
    %c0_167 = arith.constant 0 : index
    %c0_168 = arith.constant 0 : index
    %474 = vector.load %arg18[%c0_167, %c0_168] : memref<16x4xf32, #tpu.memory_space<vmem>>, vector<16x4xf32>
    %cst_169 = arith.constant dense<0.000000e+00> : vector<2x4xf32>
    %475 = tpu.matmul %472, %474, %cst_169 {dimension_numbers = #tpu.dot_dimension_numbers<[1], [0], [0], [1], [0, 0, 1, 1], [], []>} : vector<2x16xf32>, vector<16x4xf32>, vector<2x4xf32> -> vector<2x4xf32>
    %c0_170 = arith.constant 0 : index
    %c0_171 = arith.constant 0 : index
    %476 = vector.load %arg19[%c0_170, %c0_171] : memref<1x4xf32, #tpu.memory_space<vmem>>, vector<1x4xf32>
    %477 = vector.broadcast %476 : vector<1x4xf32> to vector<2x4xf32>
    %478 = arith.addf %475, %477 : vector<2x4xf32>
    %cst_172 = arith.constant dense<0xFF800000> : vector<2xf32>
    %479 = vector.multi_reduction <maximumf>, %478, %cst_172 [1] : vector<2x4xf32> to vector<2xf32>
    %480 = vector.shape_cast %479 : vector<2xf32> to vector<2x1xf32>
    %481 = vector.broadcast %480 : vector<2x1xf32> to vector<2x4xf32>
    %482 = arith.subf %478, %481 : vector<2x4xf32>
    %483 = math.exp %482 : vector<2x4xf32>
    %cst_173 = arith.constant dense<0.000000e+00> : vector<2xf32>
    %484 = vector.multi_reduction <add>, %483, %cst_173 [1] : vector<2x4xf32> to vector<2xf32>
    %485 = vector.shape_cast %484 : vector<2xf32> to vector<2x1xf32>
    %486 = math.log %485 : vector<2x1xf32>
    %487 = arith.addf %486, %480 : vector<2x1xf32>
    %488 = vector.broadcast %487 : vector<2x1xf32> to vector<2x4xf32>
    %489 = arith.subf %478, %488 : vector<2x4xf32>
    %c0_174 = arith.constant 0 : index
    %c0_175 = arith.constant 0 : index
    %490 = vector.load %arg22[%c0_174, %c0_175] : memref<2x4xf32, #tpu.memory_space<vmem>>, vector<2x4xf32>
    tpu.vector_store %arg22[%c0_174, %c0_175], %489 {strides = array<i32>} : memref<2x4xf32, #tpu.memory_space<vmem>>, vector<2x4xf32>,
    return
  }
}

</mosaic_0001>

<bundles_post_ra>
// kernel: run.1
= control target key start
LH: loop header
LB: loop body
LE: loop exit
PB: predicated region body
PF: predicated region fallthrough
CT: control target
= control target key end

     0   :  { %s3368_s0 = inlined_call_operand.vmem [shape: f32[16,16], index: 0, kind: input, shape index: {}]   ;;  %s3369_s1 = inlined_call_operand.vmem [shape: f32[16,8], index: 1, kind: input, shape index: {}]   ;;  %s3370_s2 = inlined_call_operand.vmem [shape: f32[8,32], index: 2, kind: input, shape index: {}]   ;;  %s3371_s3 = inlined_call_operand.vmem [shape: f32[1,32], index: 3, kind: input, shape index: {}]   ;;  %s3372_s4 = inlined_call_operand.vmem [shape: f32[32,32], index: 4, kind: input, shape index: {}]   ;;  %s3373_s5 = inlined_call_operand.vmem [shape: f32[1,32], index: 5, kind: input, shape index: {}]   ;;  %s3374_s6 = inlined_call_operand.vmem [shape: f32[32,32], index: 6, kind: input, shape index: {}]   ;;  %s3375_s7 = inlined_call_operand.vmem [shape: f32[1,32], index: 7, kind: input, shape index: {}]   ;;  %s3376_s8 = inlined_call_operand.vmem [shape: f32[1,32], index: 8, kind: input, shape index: {}]   ;;  %s3377_s9 = inlined_call_operand.vmem [shape: f32[1,32], index: 9, kind: input, shape index: {}]   ;;  %s3378_s10 = inlined_call_operand.vmem [shape: f32[1,32], index: 10, kind: input, shape index: {}]   ;;  %s3379_s11 = inlined_call_operand.vmem [shape: f32[1,32], index: 11, kind: input, shape index: {}]   ;;  %s3380_s12 = inlined_call_operand.vmem [shape: f32[1,32], index: 12, kind: input, shape index: {}]   ;;  %s3381_s13 = inlined_call_operand.vmem [shape: f32[1,32], index: 13, kind: input, shape index: {}]   ;;  %s3382_s14 = inlined_call_operand.vmem [shape: f32[64,32], index: 14, kind: input, shape index: {}]   ;;  %s3383_s15 = inlined_call_operand.vmem [shape: f32[1,32], index: 15, kind: input, shape index: {}]   ;;  %s3384_s16 = inlined_call_operand.vmem [shape: f32[32,16], index: 16, kind: input, shape index: {}]   ;;  %s3385_s17 = inlined_call_operand.vmem [shape: f32[1,16], index: 17, kind: input, shape index: {}]   ;;  %s3386_s18 = inlined_call_operand.vmem [shape: f32[16,4], index: 18, kind: input, shape index: {}]   ;;  %s3387_s19 = inlined_call_operand.vmem [shape: f32[1,4], index: 19, kind: input, shape index: {}]   ;;  %s3388_s20 = inlined_call_operand.hbm [shape: f32[16,32], index: 20, kind: output, shape index: {0}]   ;;  %s3389_s21 = inlined_call_operand.hbm [shape: f32[2,16], index: 21, kind: output, shape index: {1}]   ;;  %s3390_s22 = inlined_call_operand.hbm [shape: f32[2,4], index: 22, kind: output, shape index: {2}]  }
   0x1   :  { %3396 = sst [smem:[#allocation9_spill]] %s3368_s0 }
   0x2   :  { %3397 = sst [smem:[#allocation10_spill]] %s3369_s1 }
   0x3   :  { %3398 = sst [smem:[#allocation11_spill]] %s3370_s2 }
   0x4   :  { %3399 = sst [smem:[#allocation12_spill]] %s3371_s3 }
   0x5   :  { %3400 = sst [smem:[#allocation13_spill]] %s3372_s4 }
   0x6   :  { %3401 = sst [smem:[#allocation14_spill]] %s3373_s5 }
   0x7   :  { %3402 = sst [smem:[#allocation15_spill]] %s3374_s6 }
   0x8   :  { %28 = vsyncpa [#allocation3], 0  ;;  %v76_v0 = vlaneseq }
   0x9   :  { %29 = vsyncpa [#allocation5], 0  ;;  %s3403_s29 = sld [smem:[#allocation9_spill]]  ;;  %v2764_v5 = vmov 0.0   ;;  %vm89_vm1 = vcmask 130048   ;;  %s3404_s1 = sld [smem:[#allocation10_spill]] }
   0xa   :  { %v2889_v1 = vshrl.u32 %v76_v0, 7  ;;  %v2891_v2 = vand.u32 127, %v76_v0  ;;  %s3405_s26 = sld [smem:[#allocation11_spill]]  ;;  %vm3395_vm5 = vcmask 64512   ;;  %s3406_s3 = sld [smem:[#allocation12_spill]]  ;;  %vm279_vm8 = vcmask 261120  }
   0xb   :  { %v2765_v61 = vmov 1.0   ;;  %v2766_v62 = vmov 0.0|0.0   ;;  %s3414_s0 = sld [smem:[#allocation13_spill]]  ;;  %s3416_s28 = sld [smem:[#allocation14_spill]] }
   0xc   :  { %vm81_vm0 = vcmp.eq.s32.totalorder %v2889_v1, %v2891_v2  ;;  %v2901_v4 = vadd.s32 8, %v2889_v1 }
   0xd   :  { %v2904_v6 = vsel %vm81_vm0, 1.0, %v2764_v5 }
   0xe   :  { %vm82_vm2 = vcmp.eq.s32.totalorder %v2901_v4, %v2891_v2 }
   0xf   :  { %v2896_v3 = vld [vmem:[%s3403_s29] sm:$0xff]  ;;  %v2909_v7 = vld [vmem:[%s3403_s29 + $0x8] sm:$0xff]  ;;  %v2916_v9 = vsel %vm82_vm2, 1.0, %v2764_v5 }
  0x10   :  { %v87_v8 = vadd.f32 %v2904_v6, %v2896_v3  ;;  %v88_v11 = vadd.f32 %v2916_v9, %v2909_v7  ;;  %v72_v19 = vld [vmem:[%s3404_s1] sm:$0xff]  ;;  %v73_v20 = vld [vmem:[%s3404_s1 + $0x8] sm:$0xff]  ;;  %v282_v27 = vsel %vm89_vm1, %v2896_v3, 0.0  ;;  %v285_v28 = vsel %vm89_vm1, %v2909_v7, 0.0 }
  0x11   :  { %v74_v26 = vld [vmem:[%s3405_s26] sm:$0xff]  ;;  %283 = vadd.xlane.f32.xlu1 %v282_v27 }
  0x12   :  { %v90_v10 = vsel %vm89_vm1, %v87_v8, 0.0  ;;  %2447 = vmatprep.mubr.msk.f32.mxu0 %vm89_vm1, %v87_v8  ;;  %v93_v12 = vsel %vm89_vm1, %v88_v11, 0.0  ;;  %2450 = vmatprep.subr.mxu1 %v74_v26  ;;  %v2327_v37 = vld [vmem:[%s3406_s3] ss:$0 sm:$0xff] }
  0x13   :  { %91 = vadd.xlane.f32.xlu0 %v90_v10  ;;  %2451 = vmatpush3.msra.mxu1 %v74_v26 }
  0x15   :  { %286 = vadd.xlane.f32.xlu1 %v285_v28 }
  0x17   :  { %94 = vadd.xlane.f32.xlu0 %v93_v12 }
  0x9e   :  { %v284_v33 = vpop.xlane.xlu1 %283 }
  0x9f   :  { %v290_v36 = vadd.f32 1e-12, %v284_v33  ;;  %vm288_vm7 = vcmp.gt.f32.partialorder %v284_v33, 0.0  ;;  %v2623_v33 = vpack.c.bf16 %v2909_v7, %v2896_v3 }
  0xa0   :  { %v92_v13 = vpop.xlane.xlu0 %91 }
  0xa1   :  { %v98_v14 = vadd.f32 1e-12, %v92_v13  ;;  %vm96_vm3 = vcmp.gt.f32.partialorder %v92_v13, 0.0  ;;  %v472_v13 = vcvt.s32.f32 %v2901_v4 }
  0xa2   :  { %v287_v34 = vpop.xlane.xlu1 %286 }
  0xa3   :  { %2668 = vrsqrt.f32 %v98_v14  ;;  %v291_v35 = vadd.f32 1e-12, %v287_v34  ;;  %vm289_vm6 = vcmp.gt.f32.partialorder %v287_v34, 0.0  ;;  %v2961_v14 = vcvt.s32.f32 %v2891_v2 }
  0xa4   :  { %v95_v15 = vpop.xlane.xlu0 %94 }
  0xa5   :  { %v99_v16 = vadd.f32 1e-12, %v95_v15  ;;  %vm97_vm4 = vcmp.gt.f32.partialorder %v95_v15, 0.0  ;;  %v2964_v15 = vcvt.s32.f32 %v2889_v1  ;;  %vm490_vm9 = vcmp.lt.f32.partialorder %v2961_v14, %v472_v13 }
  0xa7   :  { %2670 = vrsqrt.f32 %v99_v16  ;;  %v2967_v16 = vadd.f32 0.5, %v2961_v14  ;;  %vm489_vm12 = vcmp.lt.f32.partialorder %v2961_v14, %v2964_v15 }
  0xa8   :  { %2672 = vrsqrt.f32 %v291_v35 }
  0xa9   :  { %2674 = vrsqrt.f32 %v290_v36 }
  0xad   :  { %v2669_v17 = vpop.eup %2668 }
  0xae   :  { %v102_v18 = vsel %vm96_vm3, %v2669_v17, 0.0  ;;  %v475_v17 = vadd.f32 0.5, %v472_v13 }
  0xaf   :  { %v104_v23 = vmul.f32 %v102_v18, %v72_v19 }
  0xb0   :  { %v477_v19 = vmul.f32 0.125, %v475_v17 }
  0xb1   :  { %v2671_v21 = vpop.eup %2670 }
  0xb2   :  { %v103_v22 = vsel %vm97_vm4, %v2671_v21, 0.0  ;;  %v2673_v39 = vpop.eup %2672  ;;  %v479_v4 = vfloor.f32 %v477_v19  ;;  %v3048_v19 = vmul.f32 0.25, %v2967_v16 }
  0xb3   :  { %v105_v24 = vmul.f32 %v103_v22, %v73_v20  ;;  %v2675_v42 = vpop.eup %2674  ;;  %v295_v45 = vsel %vm289_vm6, %v2673_v39, 0.0  ;;  %v481_v20 = vmul.f32 0.125, %v2967_v16 }
  0xb4   :  { %v294_v47 = vsel %vm288_vm7, %v2675_v42, 0.0 }
  0xb5   :  { %v2604_v25 = vpack.c.bf16 %v105_v24, %v104_v23  ;;  %v482_v2 = vfloor.f32 %v481_v20 }
  0xb7   :  { %2605 = vmatprep.subr.bf16.mxu0 %v2604_v25  ;;  %vm484_vm2 = vcmp.eq.f32.partialorder %v479_v4, %v482_v2 }
  0xb8   :  { %2607 = vmatpush3.bf16.msra.mxu0 %v2604_v25 }
  0xbb   :  { %2448 = vmatmul.mubr.msk.f32.vlgmr.msra.gmra.mrb[0].mxu0 %vm89_vm1, %v88_v11 }
  0xbc   :  { %2466 = vmatprep.mubr.msk.f32.mxu0 %vm89_vm1, %v2765_v61 }
 0x18e   :  { %v2449_v29 = vpop.f32.mrb[0].mxu0 }
 0x18f   :  { %v178_v30 = vpop.f32.mrb[1].mxu0  ;;  %v188_v32 = vmul.f32 %v2449_v29, %v103_v22 }
 0x190   :  { %v187_v31 = vmul.f32 %v178_v30, %v102_v18  ;;  %v2970_v18 = vadd.f32 0.5, %v2964_v15 }
 0x192   :  { %2452 = vmatprep.mubr.msk.f32.mxu1 %vm3395_vm5, %v187_v31  ;;  %v476_v21 = vmul.f32 0.125, %v2970_v18  ;;  %v1390_v14 = vmul.f32 0.5, %v2970_v18 }
 0x193   :  { %2453 = vmatmul.mubr.msk.f32.vlgmr.msra.gmra.mrb[0].mxu1 %vm3395_vm5, %v188_v32 }
 0x194   :  { %2459 = vmatprep.mubr.msk.f32.mxu1 %vm89_vm1, %v2896_v3  ;;  %v478_v23 = vfloor.f32 %v476_v21  ;;  %v2341_v3 = vld [vmem:[%s3377_s9] ss:$0 sm:$0xff] }
 0x196   :  { %vm483_vm4 = vcmp.eq.f32.partialorder %v478_v23, %v482_v2 }
 0x266   :  { %v2454_v38 = vpop.f32.mrb[0].mxu1 }
 0x267   :  { %v274_v40 = vadd.f32 %v2454_v38, %v2327_v37  ;;  %v268_v41 = vpop.f32.mrb[1].mxu1 }
 0x268   :  { %v269_v43 = vadd.f32 %v2327_v37, %v268_v41 }
 0x269   :  { %v278_v44 = vmax.f32 %v274_v40, 0.0 }
 0x26a   :  { %v277_v46 = vmax.f32 %v269_v43, 0.0 }
 0x26b   :  { %v297_v48 = vmul.f32 %v295_v45, %v278_v44  ;;  %281 = vst.msk [vmem:[#allocation2 + $0x8] sm:$0xff] %vm279_vm8, %v278_v44 }
 0x26c   :  { %v296_v49 = vmul.f32 %v294_v47, %v277_v46  ;;  %280 = vst.msk [vmem:[#allocation2] sm:$0xff] %vm279_vm8, %v277_v46  ;;  %v2620_v12 = vpack.c.bf16 %v278_v44, %v277_v46 }
 0x26e   :  { %v2608_v50 = vpack.c.bf16 %v297_v48, %v296_v49 }
 0x270   :  { %2609 = vmatprep.subr.bf16.mxu1 %v2608_v50 }
 0x271   :  { %2611 = vmatpush3.bf16.msra.mxu1 %v2608_v50 }
 0x272   :  { %2616 = vmatprep.subr.bf16.mxu1 %v2766_v62 }
 0x274   :  { %2460 = vmatmul.mubr.msk.f32.vlgmr.msra.gmra.mrb[2].mxu1 %vm89_vm1, %v2909_v7  ;;  %v2340_v7 = vld [vmem:[%s3376_s8] ss:$0 sm:$0xff] }
 0x347   :  { %v2461_v51 = vpop.f32.mrb[2].mxu1 }
 0x348   :  { %v380_v52 = vmul.f32 %v2461_v51, %v295_v45  ;;  %v370_v53 = vpop.f32.mrb[3].mxu1 }
 0x349   :  { %v379_v54 = vmul.f32 %v370_v53, %v294_v47 }
 0x34a   :  { %v382_v55 = vsub.f32 %v278_v44, %v380_v52 }
 0x34b   :  { %v381_v56 = vsub.f32 %v277_v46, %v379_v54 }
 0x34c   :  { %v384_v57 = vand.u32 2147483647, %v382_v55 }
 0x34d   :  { %v383_v58 = vand.u32 2147483647, %v381_v56 }
 0x34e   :  { %v388_v59 = vsel %vm279_vm8, %v384_v57, 0.0 }
 0x34f   :  { %389 = vadd.xlane.f32.xlu1 %v388_v59  ;;  %v385_v60 = vsel %vm279_vm8, %v383_v58, 0.0 }
 0x350   :  { %386 = vadd.xlane.f32.xlu0 %v385_v60 }
 0x3dc   :  { %v390_v63 = vpop.xlane.xlu1 %389 }
 0x3dd   :  { %v392_v0 = vmul.f32 %v2916_v9, %v390_v63  ;;  %v387_v8 = vpop.xlane.xlu0 %386 }
 0x3de   :  { %v391_v10 = vmul.f32 %v2904_v6, %v387_v8 }
 0x3e0   :  { %v2612_v11 = vpack.c.bf16 %v392_v0, %v391_v10 }
 0x3e2   :  { %2613 = vmatprep.subr.bf16.mxu0 %v2612_v11 }
 0x3e3   :  { %2615 = vmatpush3.bf16.msra.mxu0 %v2612_v11 }
 0x3e4   :  { %2619 = vmatprep.subr.bf16.mxu0 %v2766_v62 }
 0x3e6   :  { %2467 = vmatmul.mubr.msk.f32.vlgmr.msra.gmra.mrb[2].mxu0 %vm89_vm1, %v2765_v61 }
 0x3e7   :  { %2621 = vmatpush3.bf16.msra.mxu0 %v2620_v12 }
 0x3e8   :  { %2490 = vmatprep.subr.mxu0 %v2764_v5 }
 0x4b9   :  { %v2468_v22 = vpop.f32.mrb[2].mxu0 }
 0x4ba   :  { %vm486_vm10 = vcmp.gt.f32.partialorder %v2468_v22, %v390_v63  ;;  %vm488_vm11 = vcmp.eq.f32.partialorder %v2468_v22, %v390_v63  ;;  %v462_v1 = vpop.f32.mrb[3].mxu0  ;;  %v803_v22 = vfloor.f32 %v3048_v19 }
 0x4bb   :  { %vm492_vm13 = vmand %vm488_vm11, %vm490_vm9  ;;  %vm485_vm14 = vcmp.gt.f32.partialorder %v462_v1, %v387_v8  ;;  %vm487_vm15 = vcmp.eq.f32.partialorder %v462_v1, %v387_v8  ;;  %vm2767_vm9 = vmmov 0   ;;  %v3131_v1 = vfloor.f32 %v1390_v14 }
 0x4bc   :  { %vm494_vm0 = vmor %vm486_vm10, %vm492_vm13  ;;  %2473 = vmatprep.mubr.msk.f32.mxu1 %vm2767_vm9, %v2764_v5  ;;  %2480 = vmatprep.mubr.msk.f32.mxu0 %vm2767_vm9, %v2764_v5 }
 0x4bd   :  { %vm491_vm3 = vmand %vm487_vm15, %vm489_vm12  ;;  %vm958_vm15 = vcmask 1041409  }
 0x4be   :  { %vm493_vm6 = vmor %vm485_vm14, %vm491_vm3 }
 0x4bf   :  { %vm496_vm7 = vmand %vm484_vm2, %vm494_vm0  ;;  %vm3407_vm0 = vcmask 64512  }
 0x4c0   :  { %v498_v24 = vsel %vm496_vm7, 1.0, %v2764_v5  ;;  %vm495_vm5 = vmand %vm483_vm4, %vm493_vm6 }
 0x4c1   :  { %v502_v25 = vsel %vm89_vm1, %v498_v24, 0.0  ;;  %v497_v26 = vsel %vm495_vm5, 1.0, %v2764_v5  ;;  %vm3410_vm4 = vmmov %vm3407_vm0 }
 0x4c2   :  { %503 = vadd.xlane.f32.xlu1 %v502_v25  ;;  %v499_v27 = vsel %vm89_vm1, %v497_v26, 0.0  ;;  %vm3411_vm6 = vmmov %vm3407_vm0 }
 0x4c3   :  { %500 = vadd.xlane.f32.xlu0 %v499_v27  ;;  %vm3412_vm7 = vmmov %vm3407_vm0 }
 0x54f   :  { %v504_v28 = vpop.xlane.xlu1 %503 }
 0x550   :  { %v506_v29 = vmul.f32 %v2916_v9, %v504_v28  ;;  %v501_v30 = vpop.xlane.xlu0 %500  ;;  %v577_v9 = vmul.f32 0.25, %v2970_v18  ;;  %v2356_v18 = vld [vmem:[%s3378_s10] ss:$0 sm:$0xff]  ;;  %s2768_s10 = smov 32  }
 0x551   :  { %v505_v31 = vmul.f32 %v2904_v6, %v501_v30 }
 0x552   :  { %v2999_v34 = vfloor.f32 %v577_v9 }
 0x553   :  { %v2617_v32 = vpack.c.bf16 %v506_v29, %v505_v31 }
 0x554   :  { %v579_v35 = vmul.f32 4.0, %v2999_v34  ;;  %vm581_vm5 = vcmp.eq.f32.partialorder %v482_v2, %v2999_v34  ;;  %vm920_vm13 = vcmp.eq.f32.partialorder %v2999_v34, 0.0  ;;  %vm921_vm14 = vcmp.eq.f32.partialorder %v2999_v34, 1.0 }
 0x555   :  { %2618 = vmatpush3.bf16.msra.mxu1 %v2617_v32  ;;  %vm3054_vm3 = vcmp.eq.f32.partialorder %v2999_v34, %v803_v22 }
 0x556   :  { %2622 = vmatprep.subr.bf16.mxu1 %v2766_v62  ;;  %v580_v36 = vsub.f32 %v2964_v15, %v579_v35 }
 0x558   :  { %2474 = vmatmul.mubr.msk.f32.vlgmr.msra.gmra.mrb[4].mxu1 %vm89_vm1, %v2765_v61 }
 0x559   :  { %2487 = vmatprep.mubr.msk.f32.mxu1 %vm2767_vm9, %v2764_v5  ;;  %2624 = vmatpush3.bf16.msra.mxu1 %v2623_v33 }
 0x55a   :  { %2495 = vmatprep.subr.mxu1 %v2764_v5 }
 0x62b   :  { %v573_v37 = vpop.f32.mrb[4].mxu1 }
 0x62c   :  { %vm582_vm10 = vcmp.eq.f32.partialorder %v573_v37, %v580_v36  ;;  %v2475_v38 = vpop.f32.mrb[5].mxu1 }
 0x62d   :  { %vm583_vm11 = vmand %vm581_vm5, %vm582_vm10 }
 0x62e   :  { %v2335_v39 = vsel %vm583_vm11, 1.0, %v2764_v5  ;;  %vm3413_vm5 = vmmov %vm3407_vm0 }
 0x62f   :  { %2481 = vmatmul.mubr.msk.f32.vlgmr.msra.gmra.mrb[4].mxu0 %vm89_vm1, %v2335_v39  ;;  %2488 = vmatmul.mubr.msk.f32.vlgmr.msra.gmra.mrb[6].mxu1 %vm89_vm1, %v2335_v39  ;;  %vm3415_vm11 = vmmov %vm3407_vm0 }
 0x630   :  { %2491 = vmatpush3.xpose.msk.msra.mxu0 %vm89_vm1, %v2335_v39  ;;  %2492 = vmatprep.mubr.msk.f32.mxu0 %vm2767_vm9, %v2764_v5 }
 0x631   :  { %2497 = vmatprep.mubr.msk.f32.mxu1 %vm2767_vm9, %v2764_v5  ;;  %2500 = vmatprep.subr.mxu0 %v2764_v5 }
 0x702   :  { %v3021_v40 = vpop.f32.mrb[4].mxu0  ;;  %v725_v41 = vpop.f32.mrb[6].mxu1 }
 0x703   :  { %v2482_v42 = vpop.f32.mrb[5].mxu0  ;;  %v2489_v43 = vpop.f32.mrb[7].mxu1  ;;  %2493 = vmatmul.mubr.msk.f32.vlgmr.msra.gmra.mrb[6].mxu0 %vm89_vm1, %v725_v41  ;;  %v823_v44 = vmul.f32 %v2341_v3, %v3021_v40  ;;  %v813_v45 = vmul.f32 %v2340_v7, %v3021_v40  ;;  %v922_v46 = vsel %vm920_vm13, %v3021_v40, -1e+30  ;;  %v923_v47 = vsel %vm921_vm14, %v3021_v40, -1e+30 }
 0x704   :  { %2502 = vmatprep.mubr.msk.f32.mxu0 %vm2767_vm9, %v2764_v5  ;;  %v924_v50 = vsel %vm279_vm8, %v922_v46, -inf  ;;  %v931_v51 = vsel %vm279_vm8, %v923_v47, -inf  ;;  %v984_v3 = vld [vmem:[%s3414_s0] sm:$0xff]  ;;  %v985_v7 = vld [vmem:[%s3414_s0 + $0x8] sm:$0xff] }
 0x705   :  { %v824_v48 = vsel %vm279_vm8, %v823_v44, 0.0  ;;  %v814_v49 = vsel %vm279_vm8, %v813_v45, 0.0  ;;  %v925_v52 = vrot.slane %v924_v50, 4  ;;  %v932_v53 = vrot.slane %v931_v51, 4  ;;  %v2343_v44 = vld [vmem:[%s3380_s12] ss:$0 sm:$0xff] }
 0x706   :  { %825 = vadd.xlane.f32.xlu0 %v824_v48  ;;  %815 = vadd.xlane.f32.xlu1 %v814_v49  ;;  %v2626_v41 = vpack.c.bf16 %v985_v7, %v984_v3  ;;  %v975_v45 = vmul.f32 %v2343_v44, %v3021_v40  ;;  %v2344_v46 = vld [vmem:[%s3381_s13] ss:$0 sm:$0xff] }
 0x707   :  { %v926_v54 = vmax.f32 %v924_v50, %v925_v52  ;;  %v933_v55 = vmax.f32 %v931_v51, %v932_v53  ;;  %v986_v51 = vld [vmem:[%s3414_s0 + $0x10] sm:$0xff]  ;;  %v987_v52 = vld [vmem:[%s3414_s0 + $0x18] sm:$0xff]  ;;  %s3427_s0 = sld [smem:[#allocation15_spill]] }
 0x708   :  { %v983_v48 = vadd.f32 %v2344_v46, %v975_v45  ;;  %v2629_v53 = vpack.c.bf16 %v987_v52, %v986_v51  ;;  %v1615_v46 = vmul.f32 0.5, %v2967_v16 }
 0x709   :  { %v927_v56 = vrot.slane %v926_v54, 2  ;;  %v934_v57 = vrot.slane %v933_v55, 2 }
 0x70a   :  { %v1616_v51 = vfloor.f32 %v1615_v46 }
 0x70b   :  { %v928_v58 = vmax.f32 %v926_v54, %v927_v56  ;;  %v935_v59 = vmax.f32 %v933_v55, %v934_v57 }
 0x70d   :  { %v929_v60 = vrot.slane %v928_v58, 1  ;;  %v936_v63 = vrot.slane %v935_v59, 1 }
 0x70f   :  { %v930_v0 = vmax.f32 %v928_v58, %v929_v60  ;;  %v937_v8 = vmax.f32 %v935_v59, %v936_v63  ;;  %v2346_v59 = vld [vmem:[%s3416_s28] ss:$0 sm:$0xff] }
 0x711   :  { %v3039_v10 = vsel %vm958_vm15, %v937_v8, %v930_v0 }
 0x793   :  { %v826_v11 = vpop.xlane.xlu0 %825  ;;  %v816_v20 = vpop.xlane.xlu1 %815 }
 0x794   :  { %v827_v12 = vmul.f32 %v2904_v6, %v826_v11 }
 0x796   :  { %2496 = vmatpush3.msra.mxu1 %v827_v12 }
 0x797   :  { %2498 = vmatmul.mubr.msk.f32.vlgmr.msra.gmra.mrb[8].mxu1 %vm3407_vm0, %v2765_v61  ;;  %2625 = vmatprep.subr.bf16.mxu1 %v2766_v62 }
 0x798   :  { %2513 = vmatprep.mubr.msk.f32.mxu1 %vm2767_vm9, %v2764_v5  ;;  %2627 = vmatpush3.bf16.msra.mxu1 %v2626_v41 }
 0x799   :  { %2628 = vmatprep.subr.bf16.mxu1 %v2766_v62 }
 0x79c   :  { %2630 = vmatpush3.bf16.msra.mxu1 %v2629_v53 }
 0x79d   :  { %2526 = vmatprep.subr.mxu1 %v2764_v5 }
 0x7d6   :  { %v798_v13 = vpop.f32.mrb[6].mxu0 }
 0x7d7   :  { %v2494_v17 = vpop.f32.mrb[7].mxu0 }
 0x86a   :  { %v896_v21 = vpop.f32.mrb[8].mxu1 }
 0x86b   :  { %v900_v4 = vadd.f32 %v896_v21, %v816_v20  ;;  %v2499_v2 = vpop.f32.mrb[9].mxu1 }
 0x86d   :  { %vm901_vm2 = vcmp.gt.f32.partialorder %v900_v4, 0.0  ;;  %v902_v23 = vmul.f32 0.2, %v900_v4 }
 0x86f   :  { %v903_v24 = vsel %vm901_vm2, %v900_v4, %v902_v23  ;;  %vm3417_vm2 = vmmov %vm3410_vm4 }
 0x870   :  { %v904_v25 = vadd.f32 %v903_v24, %v798_v13 }
 0x872   :  { %v905_v26 = vsel %vm3054_vm3, %v904_v25, -1e+30 }
 0x873   :  { %v906_v27 = vsel %vm3410_vm4, %v905_v26, -inf  ;;  %vm3418_vm4 = vmmov %vm3417_vm2 }
 0x874   :  { %907 = vmax.xlane.f32.xlu0 %v906_v27 }
 0x901   :  { %v908_v28 = vpop.xlane.xlu0 %907 }
 0x902   :  { %v909_v29 = vsub.f32 %v905_v26, %v908_v28 }
 0x904   :  { %v910_v30 = vmul.f32 1.442695, %v909_v29 }
 0x906   :  { %2676 = vpow2.f32 %v910_v30 }
 0x910   :  { %v2677_v31 = vpop.eup %2676 }
 0x911   :  { %v912_v32 = vsel %vm3054_vm3, %v2677_v31, 0.0 }
 0x912   :  { %v913_v33 = vsel %vm3411_vm6, %v912_v32, 0.0 }
 0x913   :  { %914 = vadd.xlane.f32.xlu1 %v913_v33 }
 0x9a0   :  { %v915_v9 = vpop.xlane.xlu1 %914 }
 0x9a1   :  { %2678 = vrcp.f32 %v915_v9 }
 0x9ab   :  { %v2679_v35 = vpop.eup %2678 }
 0x9ac   :  { %v3064_v36 = vmul.f32 %v2679_v35, %v912_v32  ;;  %v1392_v32 = vmul.f32 2.0, %v3131_v1 }
 0x9ae   :  { %v1152_v37 = vsel %vm3412_vm7, %v3064_v36, 0.0  ;;  %v989_v38 = vadd.f32 %v2904_v6, %v3064_v36  ;;  %v1393_v33 = vsub.f32 %v2964_v15, %v1392_v32  ;;  %v2357_v15 = vld [vmem:[%s3379_s11] ss:$0 sm:$0xff]  ;;  %s2770_s11 = smov [#allocation2]  }
 0x9af   :  { %1153 = vadd.xlane.f32.xlu1 %v1152_v37  ;;  %s2285_s9 = sshll.u32 %s2770_s11, 4  ;;  %s3324_s9 = int_to_ptr.vmem [resolvable:$true] %s2285_s9 }
 0x9b0   :  { %v990_v39 = vsel %vm3413_vm5, %v989_v38, 0.0 }
 0x9b1   :  { %991 = vadd.xlane.f32.xlu0 %v990_v39 }
 0xa3c   :  { %v1154_v57 = vpop.xlane.xlu1 %1153 }
 0xa3d   :  { %v1156_v58 = vadd.f32 1e-12, %v1154_v57  ;;  %vm1155_vm0 = vcmp.gt.f32.partialorder %v1154_v57, 0.0  ;;  %v938_v57 = vsel %vm920_vm13, %v3021_v40, 0.0  ;;  %vm1738_vm13 = vcmp.eq.f32.partialorder %v3131_v1, 0.0 }
 0xa3e   :  { %v992_v42 = vpop.xlane.xlu0 %991 }
 0xa3f   :  { %v994_v43 = vadd.f32 1e-12, %v992_v42  ;;  %vm993_vm10 = vcmp.gt.f32.partialorder %v992_v42, 0.0 }
 0xa41   :  { %2680 = vrsqrt.f32 %v994_v43 }
 0xa42   :  { %2682 = vrsqrt.f32 %v1156_v58  ;;  %v939_v58 = vsel %vm921_vm14, %v3021_v40, 0.0  ;;  %vm1739_vm14 = vcmp.eq.f32.partialorder %v3131_v1, 1.0 }
 0xa4b   :  { %v2681_v47 = vpop.eup %2680 }
 0xa4c   :  { %v996_v49 = vsel %vm993_vm10, %v2681_v47, 0.0  ;;  %v2683_v63 = vpop.eup %2682 }
 0xa4d   :  { %v997_v50 = vmul.f32 %v996_v49, %v983_v48  ;;  %v1158_v12 = vsel %vm1155_vm0, %v2683_v63, 0.0  ;;  %vm3419_vm0 = vmmov %vm3417_vm2  ;;  %v940_v63 = vsel %vm279_vm8, %v938_v57, 0.0 }
 0xa4f   :  { %2501 = vmatpush3.msra.mxu0 %v997_v50 }
 0xa50   :  { %2503 = vmatmul.mubr.msk.f32.vlgmr.msra.gmra.mrb[8].mxu0 %vm3415_vm11, %v989_v38  ;;  %2516 = vmatprep.subr.mxu0 %v2764_v5 }
 0xa51   :  { %2518 = vmatprep.mubr.msk.f32.mxu0 %vm2767_vm9, %v2764_v5 }
 0xb23   :  { %v1067_v54 = vpop.f32.mrb[8].mxu0 }
 0xb24   :  { %v1071_v55 = vmul.f32 %v1067_v54, %v996_v49  ;;  %v2504_v56 = vpop.f32.mrb[9].mxu0 }
 0xb26   :  { %2514 = vmatmul.mubr.msk.f32.vlgmr.msra.gmra.mrb[10].mxu1 %vm279_vm8, %v1071_v55 }
 0xb27   :  { %2528 = vmatprep.mubr.msk.f32.mxu1 %vm2767_vm9, %v2764_v5 }
 0xbf9   :  { %v1147_v60 = vpop.f32.mrb[10].mxu1 }
 0xbfa   :  { %v1148_v0 = vadd.f32 %v2346_v59, %v1147_v60  ;;  %v2515_v8 = vpop.f32.mrb[11].mxu1 }
 0xbfb   :  { %v941_v8 = vrot.slane %v940_v63, 4 }
 0xbfc   :  { %v1151_v11 = vmax.f32 %v1148_v0, 0.0  ;;  %v947_v0 = vsel %vm279_vm8, %v939_v58, 0.0 }
 0xbfe   :  { %v1159_v13 = vmul.f32 %v1158_v12, %v1151_v11 }
 0xc00   :  { %2517 = vmatpush3.msra.mxu0 %v1159_v13 }
 0xc01   :  { %2519 = vmatmul.mubr.msk.f32.vlgmr.msra.gmra.mrb[10].mxu0 %vm3417_vm2, %v3064_v36  ;;  %2521 = vmatprep.subr.mxu0 %v2764_v5  ;;  %vm3420_vm2 = vmmov %vm3419_vm0 }
 0xc02   :  { %2523 = vmatprep.mubr.msk.f32.mxu0 %vm2767_vm9, %v2764_v5 }
 0xcd4   :  { %v1229_v17 = vpop.f32.mrb[10].mxu0 }
 0xcd5   :  { %v1233_v20 = vmul.f32 %v1229_v17, %v1158_v12  ;;  %v2520_v21 = vpop.f32.mrb[11].mxu0  ;;  %v942_v12 = vadd.f32 %v941_v8, %v940_v63 }
 0xcd7   :  { %v1234_v4 = vsub.f32 %v1151_v11, %v1233_v20  ;;  %v943_v17 = vrot.slane %v942_v12, 2 }
 0xcd9   :  { %v1235_v2 = vand.u32 2147483647, %v1234_v4  ;;  %v944_v40 = vadd.f32 %v943_v17, %v942_v12 }
 0xcdb   :  { %v1236_v23 = vsel %vm279_vm8, %v1235_v2, 0.0 }
 0xcdc   :  { %1237 = vadd.xlane.f32.xlu0 %v1236_v23  ;;  %v945_v23 = vrot.slane %v944_v40, 1 }
 0xd69   :  { %v1238_v24 = vpop.xlane.xlu0 %1237 }
 0xd6a   :  { %v1239_v25 = vmul.f32 %v2904_v6, %v1238_v24 }
 0xd6c   :  { %2522 = vmatpush3.msra.mxu0 %v1239_v25  ;;  %v946_v25 = vadd.f32 %v945_v23, %v944_v40 }
 0xd6d   :  { %2524 = vmatmul.mubr.msk.f32.vlgmr.msra.gmra.mrb[12].mxu0 %vm3418_vm4, %v2765_v61  ;;  %2531 = vmatprep.subr.mxu0 %v2764_v5 }
 0xd6e   :  { %2532 = vmatpush3.msra.mxu0 %v1151_v11  ;;  %2533 = vmatprep.mubr.msk.f32.mxu0 %vm2767_vm9, %v2764_v5  ;;  %v948_v11 = vrot.slane %v947_v0, 4 }
 0xd6f   :  { %2541 = vmatprep.subr.mxu0 %v2764_v5 }
 0xd70   :  { %v949_v13 = vadd.f32 %v948_v11, %v947_v0 }
 0xd72   :  { %v950_v20 = vrot.slane %v949_v13, 2 }
 0xd74   :  { %v951_v2 = vadd.f32 %v950_v20, %v949_v13 }
 0xe40   :  { %v1306_v26 = vpop.f32.mrb[12].mxu0 }
 0xe41   :  { %vm1310_vm6 = vcmp.gt.f32.partialorder %v1306_v26, %v1238_v24  ;;  %vm1311_vm7 = vcmp.eq.f32.partialorder %v1306_v26, %v1238_v24  ;;  %v2525_v27 = vpop.f32.mrb[13].mxu0  ;;  %v952_v24 = vrot.slane %v951_v2, 1 }
 0xe42   :  { %vm1312_vm5 = vmand %vm1311_vm7, %vm489_vm12  ;;  %vm1394_vm12 = vcmp.eq.f32.partialorder %v803_v22, %v3131_v1  ;;  %v954_v27 = vmul.f32 0.25, %v946_v25 }
 0xe43   :  { %vm1313_vm10 = vmor %vm1310_vm6, %vm1312_vm5  ;;  %v953_v26 = vadd.f32 %v952_v24, %v951_v2 }
 0xe44   :  { %vm1314_vm11 = vmand %vm3054_vm3, %vm1313_vm10  ;;  %vm1627_vm10 = vcmask 257024  }
 0xe45   :  { %v1315_v28 = vsel %vm1314_vm11, 1.0, %v2764_v5  ;;  %vm3421_vm6 = vmmov %vm3419_vm0 }
 0xe46   :  { %v1316_v29 = vsel %vm3419_vm0, %v1315_v28, 0.0  ;;  %vm3422_vm7 = vmmov %vm3419_vm0  ;;  %v955_v28 = vmul.f32 0.25, %v953_v26 }
 0xe47   :  { %1317 = vadd.xlane.f32.xlu1 %v1316_v29  ;;  %vm3423_vm5 = vmmov %vm3419_vm0 }
 0xe48   :  { %vm3424_vm11 = vmmov %vm3419_vm0  ;;  %vm1645_vm0 = vcmask 1043456   ;;  %v963_v29 = vsel %vm958_vm15, %v955_v28, %v954_v27  ;;  %v1788_v27 = vld [vmem:[%s3427_s0 + $0x18] sm:$0xff] }
 0xed4   :  { %v1318_v30 = vpop.xlane.xlu1 %1317 }
 0xed5   :  { %v1319_v31 = vmul.f32 %v2904_v6, %v1318_v30 }
 0xed7   :  { %2527 = vmatpush3.msra.mxu1 %v1319_v31 }
 0xed8   :  { %2529 = vmatmul.mubr.msk.f32.vlgmr.msra.gmra.mrb[12].mxu1 %vm3420_vm2, %v2765_v61  ;;  %2536 = vmatprep.subr.mxu1 %v2764_v5  ;;  %vm1642_vm2 = vcmask 31744  }
 0xed9   :  { %2537 = vmatpush3.msra.mxu1 %v3064_v36  ;;  %2538 = vmatprep.mubr.msk.f32.mxu1 %vm2767_vm9, %v2764_v5 }
 0xeda   :  { %2546 = vmatprep.subr.mxu1 %v2764_v5 }
 0xfab   :  { %v1386_v9 = vpop.f32.mrb[12].mxu1 }
 0xfac   :  { %vm1395_vm3 = vcmp.eq.f32.partialorder %v1386_v9, %v1393_v33  ;;  %v2530_v35 = vpop.f32.mrb[13].mxu1 }
 0xfad   :  { %vm1396_vm4 = vmand %vm1394_vm12, %vm1395_vm3  ;;  %vm3171_vm3 = vcmp.eq.f32.partialorder %v3131_v1, %v1616_v51 }
 0xfae   :  { %v2351_v36 = vsel %vm1396_vm4, 1.0, %v2764_v5  ;;  %vm1725_vm4 = vcmask 27648  }
 0xfaf   :  { %2534 = vmatmul.mubr.msk.f32.vlgmr.msra.gmra.mrb[14].mxu0 %vm3421_vm6, %v2351_v36  ;;  %2539 = vmatmul.mubr.msk.f32.vlgmr.msra.gmra.mrb[14].mxu1 %vm3422_vm7, %v2351_v36  ;;  %vm2021_vm7 = vcmask 523264  }
 0xfb0   :  { %2542 = vmatpush3.xpose.msk.msra.mxu0 %vm3423_vm5, %v2351_v36  ;;  %2543 = vmatprep.mubr.msk.f32.mxu0 %vm2767_vm9, %v2764_v5 }
 0xfb1   :  { %2548 = vmatprep.mubr.msk.f32.mxu1 %vm2767_vm9, %v2764_v5  ;;  %2551 = vmatprep.subr.mxu0 %v2764_v5 }
0x1082   :  { %v3153_v19 = vpop.f32.mrb[14].mxu0  ;;  %v1538_v22 = vpop.f32.mrb[14].mxu1 }
0x1083   :  { %v2535_v37 = vpop.f32.mrb[15].mxu0  ;;  %v2540_v38 = vpop.f32.mrb[15].mxu1  ;;  %2544 = vmatmul.mubr.msk.f32.vlgmr.msra.gmra.mrb[16].mxu0 %vm3424_vm11, %v1538_v22  ;;  %v1637_v39 = vmul.f32 %v2357_v15, %v3153_v19  ;;  %v1626_v3 = vmul.f32 %v2356_v18, %v3153_v19  ;;  %v1756_v31 = vsel %vm1738_vm13, %v3153_v19, 0.0  ;;  %v1757_v14 = vsel %vm1739_vm14, %v3153_v19, 0.0 }
0x1084   :  { %2553 = vmatprep.mubr.msk.f32.mxu0 %vm2767_vm9, %v2764_v5  ;;  %v1758_v32 = vsel %vm1627_vm10, %v1756_v31, 0.0  ;;  %v1765_v33 = vsel %vm1627_vm10, %v1757_v14, 0.0  ;;  %v1740_v51 = vsel %vm1738_vm13, %v3153_v19, -1e+30  ;;  %v2006_v31 = vld [vmem:[%s3382_s14] sm:$0xff]  ;;  %v2007_v14 = vld [vmem:[%s3382_s14 + $0x8] sm:$0xff] }
0x1085   :  { %v1638_v7 = vsel %vm1627_vm10, %v1637_v39, 0.0  ;;  %v1628_v41 = vsel %vm1627_vm10, %v1626_v3, 0.0  ;;  %v1759_v9 = vrot.slane %v1758_v32, 4  ;;  %v1766_v35 = vrot.slane %v1765_v33, 4 }
0x1086   :  { %1639 = vadd.xlane.f32.xlu0 %v1638_v7  ;;  %1629 = vadd.xlane.f32.xlu1 %v1628_v41  ;;  %v1742_v53 = vsel %vm1627_vm10, %v1740_v51, -inf }
0x1087   :  { %v1760_v22 = vadd.f32 %v1759_v9, %v1758_v32  ;;  %v1767_v37 = vadd.f32 %v1766_v35, %v1765_v33  ;;  %v2008_v32 = vld [vmem:[%s3382_s14 + $0x10] sm:$0xff]  ;;  %v2638_v33 = vpack.c.bf16 %v2007_v14, %v2006_v31  ;;  %v2009_v9 = vld [vmem:[%s3382_s14 + $0x18] sm:$0xff] }
0x1088   :  { %v2641_v35 = vpack.c.bf16 %v2009_v9, %v2008_v32  ;;  %v2099_v31 = vld [vmem:[%s3384_s16 + $0x18] sm:$0xff]  ;;  %v2364_v32 = vld [vmem:[%s3383_s15] ss:$0 sm:$0xff] }
0x1089   :  { %v1761_v39 = vrot.slane %v1760_v22, 2  ;;  %v1768_v3 = vrot.slane %v1767_v37, 2 }
0x108b   :  { %v1762_v7 = vadd.f32 %v1761_v39, %v1760_v22  ;;  %v1769_v41 = vadd.f32 %v1768_v3, %v1767_v37  ;;  %v2362_v22 = vld [vmem:[%s3375_s7] ss:$0 sm:$0xff] }
0x1113   :  { %v1640_v42 = vpop.xlane.xlu0 %1639  ;;  %v1630_v47 = vpop.xlane.xlu1 %1629 }
0x1114   :  { %v1641_v43 = vmul.f32 %v2904_v6, %v1640_v42  ;;  %v1763_v42 = vrot.slane %v1762_v7, 1 }
0x1116   :  { %2547 = vmatpush3.msk.msra.mxu1 %vm1645_vm0, %v1641_v43  ;;  %v1770_v43 = vrot.slane %v1769_v41, 1 }
0x1117   :  { %2549 = vmatmul.mubr.msk.f32.vlgmr.msra.gmra.mrb[16].mxu1 %vm1642_vm2, %v2765_v61  ;;  %2631 = vmatprep.subr.bf16.mxu1 %v2766_v62 }
0x1118   :  { %2564 = vmatprep.mubr.msk.f32.mxu1 %vm2767_vm9, %v2764_v5 }
0x1156   :  { %v1611_v44 = vpop.f32.mrb[16].mxu0 }
0x1157   :  { %v2545_v45 = vpop.f32.mrb[17].mxu0 }
0x1158   :  { %v1771_v45 = vadd.f32 %v1770_v43, %v1769_v41 }
0x11ea   :  { %v1715_v48 = vpop.f32.mrb[16].mxu1 }
0x11eb   :  { %v1719_v49 = vadd.f32 %v1715_v48, %v1630_v47  ;;  %v2550_v50 = vpop.f32.mrb[17].mxu1  ;;  %v1773_v47 = vmul.f32 0.5, %v1771_v45 }
0x11ed   :  { %vm1720_vm12 = vcmp.gt.f32.partialorder %v1719_v49, 0.0  ;;  %v1721_v52 = vmul.f32 0.2, %v1719_v49 }
0x11ef   :  { %v1722_v61 = vsel %vm1720_vm12, %v1719_v49, %v1721_v52  ;;  %v1786_v49 = vld [vmem:[%s3427_s0 + $0x8] sm:$0xff]  ;;  %v1741_v52 = vsel %vm1739_vm14, %v3153_v19, -1e+30 }
0x11f0   :  { %v1723_v54 = vadd.f32 %v1722_v61, %v1611_v44  ;;  %v1764_v44 = vadd.f32 %v1763_v42, %v1762_v7  ;;  %v1749_v61 = vsel %vm1627_vm10, %v1741_v52, -inf }
0x11f2   :  { %v1724_v55 = vsel %vm3171_vm3, %v1723_v54, -1e+30  ;;  %v1772_v46 = vmul.f32 0.5, %v1764_v44  ;;  %v1743_v54 = vrot.slane %v1742_v53, 4 }
0x11f3   :  { %v1726_v16 = vsel %vm1725_vm4, %v1724_v55, -inf }
0x11f4   :  { %1727 = vmax.xlane.f32.xlu0 %v1726_v16  ;;  %v1780_v48 = vsel %vm958_vm15, %v1773_v47, %v1772_v46  ;;  %v1744_v16 = vmax.f32 %v1742_v53, %v1743_v54  ;;  %v2097_v54 = vld [vmem:[%s3384_s16 + $0x8] sm:$0xff] }
0x11f6   :  { %v1745_v57 = vrot.slane %v1744_v16, 2 }
0x1281   :  { %v1728_v56 = vpop.xlane.xlu0 %1727 }
0x1282   :  { %v1729_v59 = vsub.f32 %v1724_v55, %v1728_v56  ;;  %v1750_v55 = vrot.slane %v1749_v61, 4 }
0x1284   :  { %v1730_v60 = vmul.f32 1.442695, %v1729_v59  ;;  %v1751_v56 = vmax.f32 %v1749_v61, %v1750_v55  ;;  %v1746_v59 = vmax.f32 %v1744_v16, %v1745_v57  ;;  %v2096_v61 = vld [vmem:[%s3384_s16] sm:$0xff] }
0x1286   :  { %2684 = vpow2.f32 %v1730_v60  ;;  %v1752_v58 = vrot.slane %v1751_v56, 2  ;;  %v1747_v63 = vrot.slane %v1746_v59, 1 }
0x1288   :  { %v1753_v60 = vmax.f32 %v1751_v56, %v1752_v58  ;;  %v1748_v12 = vmax.f32 %v1746_v59, %v1747_v63  ;;  %v2650_v56 = vpack.c.bf16 %v2097_v54, %v2096_v61 }
0x128a   :  { %v1754_v0 = vrot.slane %v1753_v60, 1 }
0x128c   :  { %v1755_v13 = vmax.f32 %v1753_v60, %v1754_v0 }
0x1290   :  { %v2685_v21 = vpop.eup %2684 }
0x1291   :  { %v1732_v4 = vsel %vm3171_vm3, %v2685_v21, 0.0  ;;  %v1776_v21 = vsel %vm958_vm15, %v1755_v13, %v1748_v12 }
0x1292   :  { %v1733_v34 = vsel %vm1725_vm4, %v1732_v4, 0.0 }
0x1293   :  { %1734 = vadd.xlane.f32.xlu1 %v1733_v34 }
0x12a4   :  { %964 = vrot.lane.b32.xlu1 %v963_v29, %s2768_s10 }
0x1320   :  { %v1735_v30 = vpop.xlane.xlu1 %1734 }
0x1321   :  { %2686 = vrcp.f32 %v1735_v30 }
0x1324   :  { %v965_v8 = vpop.permute.xlu1 %964 }
0x1325   :  { %v967_v20 = vsel %vm279_vm8, %v3039_v10, %v965_v8  ;;  %v1787_v10 = vld [vmem:[%s3427_s0 + $0x10] sm:$0xff] }
0x1326   :  { %v2001_v40 = vmax.f32 %v967_v20, 0.0  ;;  %v2635_v28 = vpack.c.bf16 %v1788_v27, %v1787_v10 }
0x132b   :  { %v2687_v36 = vpop.eup %2686 }
0x132c   :  { %v1737_v15 = vmul.f32 %v2687_v36, %v1732_v4  ;;  %v2010_v36 = vld [vmem:[%s3382_s14 + $0x20] sm:$0xff] }
0x132e   :  { %v1790_v18 = vadd.f32 %v2904_v6, %v1737_v15  ;;  %v1785_v6 = vld [vmem:[%s3427_s0] sm:$0xff]  ;;  %v2011_v15 = vld [vmem:[%s3382_s14 + $0x28] sm:$0xff] }
0x132f   :  { %v2632_v50 = vpack.c.bf16 %v1786_v49, %v1785_v6  ;;  %v2013_v6 = vld [vmem:[%s3382_s14 + $0x38] sm:$0xff] }
0x1330   :  { %v1791_v38 = vsel %vm1725_vm4, %v1790_v18, 0.0 }
0x1331   :  { %1792 = vadd.xlane.f32.xlu0 %v1791_v38  ;;  %2633 = vmatpush3.bf16.msra.mxu1 %v2632_v50 }
0x1332   :  { %2634 = vmatprep.subr.bf16.mxu1 %v2766_v62 }
0x1335   :  { %2636 = vmatpush3.bf16.msra.mxu1 %v2635_v28 }
0x1336   :  { %2649 = vmatprep.subr.bf16.mxu1 %v2766_v62 }
0x1347   :  { %1781 = vrot.lane.b32.xlu0 %v1780_v48, %s2768_s10  ;;  %v2012_v48 = vld [vmem:[%s3382_s14 + $0x30] sm:$0xff] }
0x1348   :  { %v2647_v51 = vpack.c.bf16 %v2013_v6, %v2012_v48 }
0x13be   :  { %v1793_v11 = vpop.xlane.xlu0 %1792 }
0x13bf   :  { %v1795_v17 = vadd.f32 1e-12, %v1793_v11  ;;  %vm1794_vm6 = vcmp.gt.f32.partialorder %v1793_v11, 0.0 }
0x13c1   :  { %2688 = vrsqrt.f32 %v1795_v17 }
0x13c2   :  { %v1782_v4 = vpop.permute.xlu0 %1781 }
0x13c3   :  { %v1784_v34 = vsel %vm279_vm8, %v1776_v21, %v1782_v4 }
0x13c4   :  { %v2002_v2 = vmax.f32 %v1784_v34, 0.0 }
0x13c6   :  { %v3224_v23 = vadd.f32 %v2002_v2, %v2001_v40 }
0x13cb   :  { %v2689_v24 = vpop.eup %2688 }
0x13cc   :  { %v1797_v25 = vsel %vm1794_vm6, %v2689_v24, 0.0 }
0x13cd   :  { %v1798_v26 = vmul.f32 %v1797_v25, %v3153_v19 }
0x13cf   :  { %2552 = vmatpush3.msk.msra.mxu0 %vm1645_vm0, %v1798_v26 }
0x13d0   :  { %2554 = vmatmul.mubr.msk.f32.vlgmr.msra.gmra.mrb[18].mxu0 %vm1642_vm2, %v1790_v18  ;;  %2637 = vmatprep.subr.bf16.mxu0 %v2766_v62  ;;  %v2644_v18 = vpack.c.bf16 %v2011_v15, %v2010_v36  ;;  %v2183_v36 = vld [vmem:[%s3386_s18] sm:$0xff] }
0x13d1   :  { %2583 = vmatprep.mubr.msk.f32.mxu0 %vm2767_vm9, %v2764_v5  ;;  %2639 = vmatpush3.bf16.msra.mxu0 %v2638_v33 }
0x13d2   :  { %2640 = vmatprep.subr.bf16.mxu0 %v2766_v62 }
0x13d5   :  { %2642 = vmatpush3.bf16.msra.mxu0 %v2641_v35 }
0x13d6   :  { %2643 = vmatprep.subr.bf16.mxu0 %v2766_v62 }
0x13d9   :  { %2645 = vmatpush3.bf16.msra.mxu0 %v2644_v18  ;;  %v2366_v18 = vld [vmem:[%s3385_s17] ss:$0 sm:$0xff]  ;;  %s2769_s17 = smov [#allocation4]  }
0x13da   :  { %2646 = vmatprep.subr.bf16.mxu0 %v2766_v62 }
0x13dd   :  { %2648 = vmatpush3.bf16.msra.mxu0 %v2647_v51 }
0x14a3   :  { %v1871_v19 = vpop.f32.mrb[18].mxu0 }
0x14a4   :  { %v1875_v29 = vmul.f32 %v1871_v19, %v1797_v25  ;;  %v2555_v30 = vpop.f32.mrb[19].mxu0 }
0x14a5   :  { %v2098_v30 = vld [vmem:[%s3384_s16 + $0x10] sm:$0xff] }
0x14a6   :  { %2565 = vmatmul.mubr.msk.f32.vlgmr.msra.gmra.mrb[18].mxu1 %vm279_vm8, %v1875_v29  ;;  %v2653_v14 = vpack.c.bf16 %v2099_v31, %v2098_v30 }
0x14a7   :  { %2594 = vmatprep.mubr.msk.f32.mxu1 %vm2767_vm9, %v2764_v5  ;;  %2651 = vmatpush3.bf16.msra.mxu1 %v2650_v56 }
0x14a8   :  { %2652 = vmatprep.subr.bf16.mxu1 %v2766_v62 }
0x14ab   :  { %2654 = vmatpush3.bf16.msra.mxu1 %v2653_v14 }
0x14ac   :  { %2655 = vmatprep.subr.bf16.mxu1 %v2766_v62  ;;  %v2184_v62 = vld [vmem:[%s3386_s18 + $0x8] sm:$0xff]  ;;  %s2298_s18 = sshll.u32 %s2769_s17, 4  ;;  %s2299_s18 = int_to_ptr.vmem [resolvable:$true] %s2298_s18 }
0x14ad   :  { %v2656_v15 = vpack.c.bf16 %v2184_v62, %v2183_v36  ;;  %p2699_p1 = scmp.lt.s32.totalorder %s2299_s18, %s2299_s18 }
0x1579   :  { %v1951_v37 = vpop.f32.mrb[18].mxu1 }
0x157a   :  { %v1952_v38 = vadd.f32 %v2362_v22, %v1951_v37  ;;  %v2566_v39 = vpop.f32.mrb[19].mxu1 }
0x157c   :  { %v1955_v3 = vmax.f32 %v1952_v38, 0.0 }
0x157e   :  { %v1972_v7 = vsel %vm1738_vm13, %v1955_v3, 0.0  ;;  %v1973_v41 = vsel %vm1739_vm14, %v1955_v3, 0.0  ;;  %v1956_v0 = vsel %vm1738_vm13, %v1955_v3, -1e+30  ;;  %v1957_v8 = vsel %vm1739_vm14, %v1955_v3, -1e+30 }
0x157f   :  { %v1974_v42 = vsel %vm1627_vm10, %v1972_v7, 0.0  ;;  %v1981_v43 = vsel %vm1627_vm10, %v1973_v41, 0.0  ;;  %v1958_v11 = vsel %vm1627_vm10, %v1956_v0, -inf  ;;  %v1965_v12 = vsel %vm1627_vm10, %v1957_v8, -inf }
0x1580   :  { %v1975_v44 = vrot.slane %v1974_v42, 4  ;;  %v1982_v45 = vrot.slane %v1981_v43, 4  ;;  %v1959_v13 = vrot.slane %v1958_v11, 4  ;;  %v1966_v17 = vrot.slane %v1965_v12, 4 }
0x1582   :  { %v1976_v46 = vadd.f32 %v1975_v44, %v1974_v42  ;;  %v1983_v47 = vadd.f32 %v1982_v45, %v1981_v43  ;;  %v1960_v20 = vmax.f32 %v1958_v11, %v1959_v13  ;;  %v1967_v21 = vmax.f32 %v1965_v12, %v1966_v17 }
0x1584   :  { %v1977_v49 = vrot.slane %v1976_v46, 2  ;;  %v1984_v50 = vrot.slane %v1983_v47, 2  ;;  %v1961_v4 = vrot.slane %v1960_v20, 2  ;;  %v1968_v34 = vrot.slane %v1967_v21, 2 }
0x1586   :  { %v1978_v52 = vadd.f32 %v1977_v49, %v1976_v46  ;;  %v1985_v53 = vadd.f32 %v1984_v50, %v1983_v47  ;;  %v1962_v40 = vmax.f32 %v1960_v20, %v1961_v4  ;;  %v1969_v2 = vmax.f32 %v1967_v21, %v1968_v34 }
0x1588   :  { %v1979_v55 = vrot.slane %v1978_v52, 1  ;;  %v1986_v16 = vrot.slane %v1985_v53, 1  ;;  %v1963_v24 = vrot.slane %v1962_v40, 1  ;;  %v1970_v25 = vrot.slane %v1969_v2, 1 }
0x158a   :  { %v1980_v57 = vadd.f32 %v1979_v55, %v1978_v52  ;;  %v1987_v58 = vadd.f32 %v1986_v16, %v1985_v53  ;;  %v1964_v26 = vmax.f32 %v1962_v40, %v1963_v24  ;;  %v1971_v10 = vmax.f32 %v1969_v2, %v1970_v25 }
0x158c   :  { %v1988_v59 = vmul.f32 0.5, %v1980_v57  ;;  %v1989_v60 = vmul.f32 0.5, %v1987_v58  ;;  %v1992_v1 = vsel %vm958_vm15, %v1971_v10, %v1964_v26 }
0x158e   :  { %v1996_v63 = vsel %vm958_vm15, %v1989_v60, %v1988_v59 }
0x158f   :  { %1997 = vrot.lane.b32.xlu1 %v1996_v63, %s2768_s10 }
0x1601   :  { %v1998_v27 = vpop.permute.xlu1 %1997 }
0x1602   :  { %v2000_v28 = vsel %vm279_vm8, %v1992_v1, %v1998_v27 }
0x1603   :  { %v2004_v19 = vmax.f32 %v2000_v28, 0.0 }
0x1605   :  { %v2005_v29 = vadd.f32 %v2004_v19, %v3224_v23 }
0x1607   :  { %2584 = vmatmul.mubr.msk.f32.vlgmr.msra.gmra.mrb[20].mxu0 %vm2021_vm7, %v2005_v29 }
0x16da   :  { %v2091_v33 = vpop.f32.mrb[20].mxu0 }
0x16db   :  { %v2092_v9 = vadd.f32 %v2364_v32, %v2091_v33  ;;  %v2585_v23 = vpop.f32.mrb[21].mxu0 }
0x16dd   :  { %v2095_v35 = vmax.f32 %v2092_v9, 0.0 }
0x16df   :  { %2595 = vmatmul.mubr.msk.f32.vlgmr.msra.gmra.mrb[20].mxu1 %vm279_vm8, %v2095_v35  ;;  %vm2181_vm8 = vcmask 123904  }
0x16e0   :  { %2601 = vmatprep.mubr.msk.f32.mxu1 %vm2767_vm9, %v2764_v5  ;;  %2657 = vmatpush3.bf16.msra.mxu1 %v2656_v15  ;;  %v2368_v5 = vld [vmem:[%s3387_s19] ss:$0 sm:$0xff]  ;;  %vm2265_vm9 = vcmask 25600   ;;  %s2694_s19 = scalar_lea.vmem %s2299_s18, 32 }
0x16e1   :  { %p2695_p0 = scmp.ne.s32.totalorder %s2299_s18, %s2694_s19  ;;  %p2700_p2 = scmp.lt.s32.totalorder %s2694_s19, %s2694_s19 }
0x16e3   :  { %p2701_p3 = por %p2700_p2, %p2699_p1 }
0x16e5   :  { %p2702_p4 = pnand %p2701_p3, %p2695_p0 }
0x17b2   :  { %v2176_v22 = vpop.f32.mrb[20].mxu1 }
0x17b3   :  { %v2177_v37 = vadd.f32 %v2366_v18, %v2176_v22  ;;  %v2596_v38 = vpop.f32.mrb[21].mxu1 }
0x17b5   :  { %v2180_v39 = vmax.f32 %v2177_v37, 0.0 }
0x17b7   :  { %2602 = vmatmul.mubr.msk.f32.vlgmr.msra.gmra.mrb[22].mxu1 %vm89_vm1, %v2180_v39  ;;  %2182 = vst.msk [vmem:[#allocation4] sm:$0x3] %vm2181_vm8, %v2180_v39 }
0x188a   :  { %v2261_v3 = vpop.f32.mrb[22].mxu1 }
0x188b   :  { %v2262_v7 = vadd.f32 %v2368_v5, %v2261_v3  ;;  %v2603_v41 = vpop.f32.mrb[23].mxu1 }
0x188d   :  { %v2266_v42 = vsel %vm2265_vm9, %v2262_v7, -inf }
0x188e   :  { %2267 = vmax.xlane.f32.xlu1 %v2266_v42 }
0x191b   :  { %v2268_v43 = vpop.xlane.xlu1 %2267 }
0x191c   :  { %v2269_v44 = vsub.f32 %v2262_v7, %v2268_v43 }
0x191e   :  { %v2270_v45 = vmul.f32 1.442695, %v2269_v44 }
0x1920   :  { %2690 = vpow2.f32 %v2270_v45 }
0x192a   :  { %v2691_v46 = vpop.eup %2690 }
0x192b   :  { %v2272_v47 = vsel %vm2265_vm9, %v2691_v46, 0.0 }
0x192c   :  { %2273 = vadd.xlane.f32.xlu0 %v2272_v47 }
0x192d   :  { %2705 = shalt.err (!%p2702_p4)
}
0x192e   :  { %s2706_s7 = scalar_lea.hbm %s3389_s21, 32 }
0x192f   :  { %p2707_p5 = scmp.ne.s32.totalorder %s3389_s21, %s2706_s7  ;;  %p2710_p6 = scmp.lt.u32.totalorder %s2706_s7, %s3389_s21 }
0x1931   :  { %p2712_p7 = pnand %p2710_p6, %p2707_p5 }
0x1933   :  { %2715 = shalt.err (!%p2712_p7)
}
0x1934   :  { %2301 = dma.vmem_to_hbm [thread:$0]  %s2299_s18, 32, %s3389_s21, [#allocation5]  }
0x1935   :  { %s2716_s14 = scalar_lea.vmem %s3324_s9, 256  ;;  %p2721_p9 = scmp.lt.s32.totalorder %s3324_s9, %s3324_s9 }
0x1936   :  { %p2717_p8 = scmp.ne.s32.totalorder %s3324_s9, %s2716_s14  ;;  %p2722_p10 = scmp.lt.s32.totalorder %s2716_s14, %s2716_s14 }
0x1938   :  { %p2723_p11 = por %p2722_p10, %p2721_p9 }
0x193a   :  { %p2724_p12 = pnand %p2723_p11, %p2717_p8 }
0x193c   :  { %2727 = shalt.err (!%p2724_p12)
}
0x193d   :  { %s2728_s2 = scalar_lea.hbm %s3388_s20, 256 }
0x193e   :  { %p2729_p13 = scmp.ne.s32.totalorder %s3388_s20, %s2728_s2  ;;  %p2732_p0 = scmp.lt.u32.totalorder %s2728_s2, %s3388_s20 }
0x1940   :  { %p2734_p1 = pnand %p2732_p0, %p2729_p13 }
0x1942   :  { %2737 = shalt.err (!%p2734_p1)
}
0x1943   :  { %s2771_s21 = smov 128   ;;  %s2772_s16 = smov 8  }
0x1944   :  { %2291 = dma.vmem_to_hbm [thread:$0]  %s3324_s9, 256, %s3388_s20, [#allocation3], %s2771_s21, %s2771_s21, %s2772_s16  }
0x1945   :  { %s2773_s30 = smov [#allocation6]  }
0x1946   :  { %s2308_s4 = sshll.u32 %s2773_s30, 4  ;;  %s2309_s4 = int_to_ptr.vmem [resolvable:$true] %s2308_s4 }
0x1947   :  { %s2738_s8 = scalar_lea.vmem %s2309_s4, 32  ;;  %p2743_p3 = scmp.lt.s32.totalorder %s2309_s4, %s2309_s4 }
0x1948   :  { %p2739_p2 = scmp.ne.s32.totalorder %s2309_s4, %s2738_s8  ;;  %p2744_p4 = scmp.lt.s32.totalorder %s2738_s8, %s2738_s8 }
0x194a   :  { %p2745_p5 = por %p2744_p4, %p2743_p3 }
0x194c   :  { %p2746_p6 = pnand %p2745_p5, %p2739_p2 }
0x19b9   :  { %v2274_v48 = vpop.xlane.xlu0 %2273 }
0x19ba   :  { %2692 = vlog2.f32 %v2274_v48 }
0x19c4   :  { %v2693_v6 = vpop.eup %2692 }
0x19c5   :  { %v2276_v49 = vmul.f32 0.6931472, %v2693_v6 }
0x19c7   :  { %v2277_v50 = vadd.f32 %v2276_v49, %v2268_v43 }
0x19c9   :  { %v2278_v51 = vsub.f32 %v2262_v7, %v2277_v50 }
0x19cb   :  { %2279 = vst.msk [vmem:[#allocation6] sm:$0x3] %vm2265_vm9, %v2278_v51 }
0x19cc   :  { %2749 = shalt.err (!%p2746_p6)
}
0x19cd   :  { %s2750_s18 = scalar_lea.hbm %s3390_s22, 32 }
0x19ce   :  { %p2751_p7 = scmp.ne.s32.totalorder %s3390_s22, %s2750_s18  ;;  %p2754_p8 = scmp.lt.u32.totalorder %s2750_s18, %s3390_s22 }
0x19d0   :  { %p2756_p9 = pnand %p2754_p8, %p2751_p7 }
0x19d2   :  { %2759 = shalt.err (!%p2756_p9)
}
0x19d3   :  { %2311 = dma.vmem_to_hbm [thread:$0]  %s2309_s4, 32, %s3390_s22, [#allocation5]  }
0x19d4   :  { %2760 = dma.done.wait [#allocation3], 256  }
0x19d5   :  { %2761 = vsyncadd [#allocation3], 4294967040 }
0x19d6   :  { %2762 = dma.done.wait [#allocation5], 64  }
0x19d7   :  { %2763 = vsyncadd [#allocation5], 4294967232 }
0x19d8   :  { %2321 = vsyncpa [#allocation3], 1 }
0x19d9   :  { %2322 = vsyncpa [#allocation5], 1 }

</bundles_post_ra>
